<compile_context>
chip_gen: v5e
topology: v5e:2x2
jax: 0.10.0
libtpu: 0.0.40
codegen_flags: <defaults>
</compile_context>

<pallas_src>
import functools

import jax
import jax.numpy as jnp
from jax import lax
from jax.experimental import pallas as pl
from jax.experimental.pallas import tpu as pltpu


def _round_up(n, m):
    return -(-n // m) * m


# --------------------------------------------------------------------------- #
# Fused Pallas kernel:
#   e    = proj(out_last) - degLF            (low-res, VMEM scratch)
#   err1 = delta * recon(e)                  (hi-res, VMEM scratch; delta in MR)
#   out  = out_last - err1                   (err2 == 0: identity RefNet stand-in)
# --------------------------------------------------------------------------- #
def stage_fused_kernel(x_ref, deg_ref, mp_ref, mr_ref, out_ref, e_ref, err_ref):
    """
    x_ref  : (NB, C, X, S*HY)  out_lastStage, hi-res rows grouped by S:
                               x_ref[n, c, i, r*HY + w] == out_last[n, c, i*S + r, w]
    deg_ref: (NB, C, X, Y)     degraded LF (low-res)
    mp_ref : (K, C, HY, Y)     width-tap contraction matrices for `proj`  (K = 2*S)
    mr_ref : (K, C, Y, HY)     width-tap expansion matrices for `recon`, pre-scaled
                               by delta
    out_ref: (NB, C, X, S*HY)  out_currentStage (same row-group packing as x_ref)
    e_ref  : VMEM (C, X, Y)        scratch: proj(out_last) - degLF
    err_ref: VMEM (C, X, S*HY)     scratch: delta * recon(e)
    """
    nb, c, x, shy = x_ref.shape
    K, _, hy, y = mp_ref.shape
    s = K // 2
    p = s // 2
    assert shy == s * hy

    for n in range(nb):
        # ----------------- e = proj(out_last) - degLF (stays in VMEM) -----------
        e_ref[...] = -deg_ref[n]
        for ki in range(K):
            d = (ki - p) // s            # row-group shift in {-1, 0, +1}
            r = (ki - p) - d * s         # hi-res row phase within a group
            lo, hi = max(0, -d), min(x, x - d)
            if lo >= hi:
                continue
            # Contiguous slice: row phase r of groups [lo+d, hi+d), full width.
            rows = x_ref[n, :, lo + d:hi + d, r * hy:(r + 1) * hy]   # (C, hi-lo, HY)
            e_ref[:, lo:hi, :] += jnp.einsum(
                "ciw,cwj->cij", rows, mp_ref[ki],
                preferred_element_type=jnp.float32)

        # ----------------- err1 = delta * recon(e) (stays in VMEM) --------------
        err_ref[...] = jnp.zeros_like(err_ref)
        for ki in range(K):
            d = (ki - p) // s
            r = (ki - p) - d * s
            lo, hi = max(0, -d), min(x, x - d)
            if lo >= hi:
                continue
            contrib = jnp.einsum(
                "cij,cjn->cin", e_ref[:, lo:hi, :], mr_ref[ki],
                preferred_element_type=jnp.float32)                 # (C, hi-lo, HY)
            err_ref[:, lo + d:hi + d, r * hy:(r + 1) * hy] += contrib

        # ----------------- combine, single lane-dense full-block store ----------
        # TODO(synk): RefNet is not defined in the provided module source; with the
        # identity stand-in err2 == 0, so the eta*err2 term drops out here.
        out_ref[n] = x_ref[n] - err_ref[...]


# --------------------------------------------------------------------------- #
# Weight preprocessing: width-direction taps of a depthwise stride-s conv as a
# dense per-channel (HY x Y) banded matrix (tiny, built once from the weights).
# --------------------------------------------------------------------------- #
def _column_tap_matrix(w, s, p, y, hy):
    """M[ki, c, w_idx, j] = w[c, ki, w_idx - j*s + p] if the tap is in range else 0."""
    c, K, _ = w.shape
    wi = jnp.arange(hy)[:, None]                         # (HY, 1)
    ji = jnp.arange(y)[None, :]                          # (1, Y)
    kj = wi - ji * s + p                                 # (HY, Y) column-tap index
    valid = (kj >= 0) & (kj < K)
    kj_c = jnp.clip(kj, 0, K - 1)
    m = jnp.where(valid[None, None], w[:, :, kj_c], 0.0)  # (C, K, HY, Y)
    return jnp.transpose(m, (1, 0, 2, 3))                 # (K, C, HY, Y)


def _pick_samples_per_block(buv, per_sample_bytes, cap_bytes=4 << 20):
    """Largest divisor of buv whose block fits the VMEM budget and keeps >=2 grid
    steps (so both v7x TensorCores get work)."""
    nb = 1
    for cand in range(1, buv + 1):
        if buv % cand:
            continue
        if cand * per_sample_bytes > cap_bytes:
            continue
        if buv >= 2 and buv // cand < 2:
            continue
        nb = cand
    return nb


# --------------------------------------------------------------------------- #
# Wrapper: only free reshapes + tiny weight preprocessing outside the kernel.
# --------------------------------------------------------------------------- #
def stage_block_forward(out_last, degLF, w_proj, w_recon, delta, eta, scale):
    s = int(scale)
    assert s % 2 == 0, "scaleFactor must be even (padding = scaleFactor/2)"
    p = s // 2
    K = 2 * s
    assert w_proj.shape[-1] == K and w_recon.shape[-1] == K, \
        "layout assumes kernel_size == 2*scaleFactor, padding == scaleFactor/2"
    b, u, v, c, x, y = degLF.shape
    buv = b * u * v
    hx, hy = x * s, y * s
    assert out_last.shape == (buv, c, hx, hy)
    f32 = jnp.float32

    # TODO(synk): RefNet's definition is not part of the provided module source; an
    # identity stand-in is used, so err2 == out_last - refnet(out_last) == 0 and the
    # eta branch (plus its two 6-D permutes and extra hi-res HBM read) is dropped.
    del eta

    # Width-tap matrices (weight-derived, tiny). delta folded into the recon taps.
    wp_k = w_proj[:, 0].astype(f32)                               # (C, K, K)
    wr_k = w_recon[:, 0].astype(f32)
    mp = _column_tap_matrix(wp_k, s, p, y, hy)                    # (K, C, HY, Y)
    mr = delta.reshape(()).astype(f32) * jnp.swapaxes(
        _column_tap_matrix(wr_k, s, p, y, hy), -1, -2)            # (K, C, Y, HY)

    # Free (bitcast) reshapes only -- no HBM repack passes.
    x_in = out_last.astype(f32).reshape(buv, c, x, s * hy)
    deg_in = degLF.astype(f32).reshape(buv, c, x, y)

    # Samples per block: amortize per-grid-step overhead, stay well inside VMEM.
    lane_x = _round_up(s * hy, 128)
    lane_d = _round_up(y, 128)
    sub = _round_up(x, 8)
    per_sample = 2 * 4 * c * sub * (2 * lane_x + lane_d)  # double-buffered f32 bytes
    nb = _pick_samples_per_block(buv, per_sample)

    out = pl.pallas_call(
        stage_fused_kernel,
        out_shape=jax.ShapeDtypeStruct((buv, c, x, s * hy), f32),
        grid=(buv // nb,),
        in_specs=[
            pl.BlockSpec((nb, c, x, s * hy), lambda n: (n, 0, 0, 0)),
            pl.BlockSpec((nb, c, x, y), lambda n: (n, 0, 0, 0)),
            pl.BlockSpec((K, c, hy, y), lambda n: (0, 0, 0, 0)),
            pl.BlockSpec((K, c, y, hy), lambda n: (0, 0, 0, 0)),
        ],
        out_specs=pl.BlockSpec((nb, c, x, s * hy), lambda n: (n, 0, 0, 0)),
        scratch_shapes=[
            pltpu.VMEM((c, x, y), f32),          # e = proj(X) - degLF
            pltpu.VMEM((c, x, s * hy), f32),     # delta * recon(e)
        ],
        compiler_params=pltpu.CompilerParams(
            dimension_semantics=("parallel",)),
    )(x_in, deg_in, mp, mr)

    return out.reshape(buv, c, hx, hy)


# --------------------------------------------------------------------------- #
# Pure-JAX reference (XLA convolutions) for correctness checking
# --------------------------------------------------------------------------- #
def stage_block_reference(out_last, degLF, w_proj, w_recon, delta, eta, scale):
    s = int(scale)
    p = s // 2
    K = 2 * s
    b, u, v, c, x, y = degLF.shape
    buv = b * u * v
    deg_flat = degLF.reshape(buv, c, x, y)
    dn = ("NCHW", "OIHW", "NCHW")
    proj = lax.conv_general_dilated(out_last, w_proj, window_strides=(s, s),
                                    padding=[(p, p), (p, p)],
                                    dimension_numbers=dn, feature_group_count=c)
    e = proj - deg_flat
    w_flip = w_recon[:, :, ::-1, ::-1]
    err1 = lax.conv_general_dilated(e, w_flip, window_strides=(1, 1),
                                    padding=[(K - 1 - p, K - 1 - p)] * 2,
                                    lhs_dilation=(s, s),
                                    dimension_numbers=dn, feature_group_count=c)
    refnet_flat = out_last  # identity RefNet stand-in (matches kernel path)
    err2 = out_last - refnet_flat
    return out_last - delta[0] * (err1 + eta[0] * err2)


# --------------------------------------------------------------------------- #
if __name__ == "__main__":
    key = jax.random.PRNGKey(0)
    b, u, v, c = 1, 2, 2, 4          # channelNum = 4
    x = y = 8                        # low-res spatial
    s = 2                            # scaleFactor
    hx, hy = x * s, y * s
    K = 2 * s
    k1, k2, k3, k4, k5, k6 = jax.random.split(key, 6)

    out_lastStage = jax.random.normal(k1, (b * u * v, c, hx, hy), jnp.float32)
    degLF = jax.random.normal(k2, (b, u, v, c, x, y), jnp.float32)

    # xavier_uniform_ on weight shape (C, 1, K, K): bound = sqrt(6/(fan_in+fan_out))
    fan_in = 1 * K * K
    fan_out = c * K * K
    bound = (6.0 / (fan_in + fan_out)) ** 0.5
    w_proj = jax.random.uniform(k3, (c, 1, K, K), jnp.float32, -bound, bound)
    w_recon = jax.random.uniform(k4, (c, 1, K, K), jnp.float32, -bound, bound)
    delta = jax.random.uniform(k5, (1,), jnp.float32)   # torch.rand([1])
    eta = jax.random.uniform(k6, (1,), jnp.float32)     # torch.rand([1])

    fwd = jax.jit(functools.partial(stage_block_forward, scale=s))
    out = jax.block_until_ready(fwd(out_lastStage, degLF, w_proj, w_recon, delta, eta))

    ref = stage_block_reference(out_lastStage, degLF, w_proj, w_recon, delta, eta, s)
    assert out.shape == (b * u * v, c, hx, hy)
    assert out.dtype == jnp.float32
    # Tolerance accommodates MXU accumulation of the f32 tap matmuls; genuine
    # indexing/semantics bugs produce O(0.1) errors and would still trip this check.
    assert jnp.allclose(out, ref, rtol=1e-2, atol=1e-2), float(jnp.max(jnp.abs(out - ref)))

    print("KERNEL_OK")
</pallas_src>

<mosaic_0001>
module attributes {stable_mosaic.version = 11 : i64} {
  func.func @stage_fused_kernel(%arg0: i32, %arg1: memref<2x4x8x32xf32, #tpu.memory_space<vmem>>, %arg2: memref<2x4x8x8xf32, #tpu.memory_space<vmem>>, %arg3: memref<4x4x16x8xf32, #tpu.memory_space<vmem>>, %arg4: memref<4x4x8x16xf32, #tpu.memory_space<vmem>>, %arg5: memref<2x4x8x32xf32, #tpu.memory_space<vmem>>, %arg6: memref<4x8x8xf32, #tpu.memory_space<vmem>>, %arg7: memref<4x8x32xf32, #tpu.memory_space<vmem>>) attributes {dimension_semantics = [#tpu.dimension_semantics<parallel>], iteration_bounds = array<i64: 2>, scalar_prefetch = 0 : i64, scratch_operands = 2 : i64, tpu.core_type = #tpu.core_type<tc>, window_params = [{transform_indices = @transform_0, window_bounds = array<i64: 2, 4, 8, 32>}, {transform_indices = @transform_1, window_bounds = array<i64: 2, 4, 8, 8>}, {pipeline_mode = #tpu.pipeline_mode<synchronous>, transform_indices = @transform_2, window_bounds = array<i64: 4, 4, 16, 8>}, {pipeline_mode = #tpu.pipeline_mode<synchronous>, transform_indices = @transform_3, window_bounds = array<i64: 4, 4, 8, 16>}, {transform_indices = @transform_4, window_bounds = array<i64: 2, 4, 8, 32>}]} {
    %c0 = arith.constant 0 : index
    %c0_0 = arith.constant 0 : index
    %c0_1 = arith.constant 0 : index
    %c0_2 = arith.constant 0 : index
    %0 = vector.load %arg2[%c0, %c0_0, %c0_1, %c0_2] : memref<2x4x8x8xf32, #tpu.memory_space<vmem>>, vector<1x4x8x8xf32>
    %1 = vector.shape_cast %0 : vector<1x4x8x8xf32> to vector<4x8x8xf32>
    %cst = arith.constant 0.000000e+00 : f32
    %2 = vector.broadcast %cst : f32 to vector<4x8x8xf32>
    %3 = arith.subf %2, %1 : vector<4x8x8xf32>
    %c0_3 = arith.constant 0 : index
    %c0_4 = arith.constant 0 : index
    %c0_5 = arith.constant 0 : index
    %4 = vector.load %arg6[%c0_3, %c0_4, %c0_5] : memref<4x8x8xf32, #tpu.memory_space<vmem>>, vector<4x8x8xf32>
    tpu.vector_store %arg6[%c0_3, %c0_4, %c0_5], %3 {strides = array<i32>} : memref<4x8x8xf32, #tpu.memory_space<vmem>>, vector<4x8x8xf32>,
    %c0_6 = arith.constant 0 : index
    %c0_7 = arith.constant 0 : index
    %c0_8 = arith.constant 0 : index
    %c16 = arith.constant 16 : index
    %5 = vector.load %arg1[%c0_6, %c0_7, %c0_8, %c16] : memref<2x4x8x32xf32, #tpu.memory_space<vmem>>, vector<1x4x7x16xf32>
    %6 = vector.shape_cast %5 : vector<1x4x7x16xf32> to vector<4x7x16xf32>
    %c0_9 = arith.constant 0 : index
    %c1 = arith.constant 1 : index
    %c0_10 = arith.constant 0 : index
    %7 = vector.load %arg6[%c0_9, %c1, %c0_10] : memref<4x8x8xf32, #tpu.memory_space<vmem>>, vector<4x7x8xf32>
    %c0_11 = arith.constant 0 : index
    %c0_12 = arith.constant 0 : index
    %c0_13 = arith.constant 0 : index
    %c0_14 = arith.constant 0 : index
    %8 = vector.load %arg3[%c0_11, %c0_12, %c0_13, %c0_14] : memref<4x4x16x8xf32, #tpu.memory_space<vmem>>, vector<1x4x16x8xf32>
    %9 = vector.shape_cast %8 : vector<1x4x16x8xf32> to vector<4x16x8xf32>
    "tpu.trace_start"() <{level = 10 : i32, message = "ciw,cwj->cij"}> : () -> ()
    %cst_15 = arith.constant dense<0.000000e+00> : vector<4x7x8xf32>
    %10 = tpu.matmul %6, %9, %cst_15 {dimension_numbers = #tpu.dot_dimension_numbers<[2], [1], [1], [2], [0, 0, 0, 1, 1, 2], [0], [0]>} : vector<4x7x16xf32>, vector<4x16x8xf32>, vector<4x7x8xf32> -> vector<4x7x8xf32>
    "tpu.trace_stop"() : () -> ()
    %11 = arith.addf %7, %10 : vector<4x7x8xf32>
    %c0_16 = arith.constant 0 : index
    %c1_17 = arith.constant 1 : index
    %c0_18 = arith.constant 0 : index
    %12 = vector.load %arg6[%c0_16, %c1_17, %c0_18] : memref<4x8x8xf32, #tpu.memory_space<vmem>>, vector<4x7x8xf32>
    tpu.vector_store %arg6[%c0_16, %c1_17, %c0_18], %11 {strides = array<i32>} : memref<4x8x8xf32, #tpu.memory_space<vmem>>, vector<4x7x8xf32>,
    %c0_19 = arith.constant 0 : index
    %c0_20 = arith.constant 0 : index
    %c0_21 = arith.constant 0 : index
    %c0_22 = arith.constant 0 : index
    %13 = vector.load %arg1[%c0_19, %c0_20, %c0_21, %c0_22] : memref<2x4x8x32xf32, #tpu.memory_space<vmem>>, vector<1x4x8x16xf32>
    %14 = vector.shape_cast %13 : vector<1x4x8x16xf32> to vector<4x8x16xf32>
    %c0_23 = arith.constant 0 : index
    %c0_24 = arith.constant 0 : index
    %c0_25 = arith.constant 0 : index
    %15 = vector.load %arg6[%c0_23, %c0_24, %c0_25] : memref<4x8x8xf32, #tpu.memory_space<vmem>>, vector<4x8x8xf32>
    %c1_26 = arith.constant 1 : index
    %c0_27 = arith.constant 0 : index
    %c0_28 = arith.constant 0 : index
    %c0_29 = arith.constant 0 : index
    %16 = vector.load %arg3[%c1_26, %c0_27, %c0_28, %c0_29] : memref<4x4x16x8xf32, #tpu.memory_space<vmem>>, vector<1x4x16x8xf32>
    %17 = vector.shape_cast %16 : vector<1x4x16x8xf32> to vector<4x16x8xf32>
    "tpu.trace_start"() <{level = 10 : i32, message = "ciw,cwj->cij"}> : () -> ()
    %cst_30 = arith.constant dense<0.000000e+00> : vector<4x8x8xf32>
    %18 = tpu.matmul %14, %17, %cst_30 {dimension_numbers = #tpu.dot_dimension_numbers<[2], [1], [1], [2], [0, 0, 0, 1, 1, 2], [0], [0]>} : vector<4x8x16xf32>, vector<4x16x8xf32>, vector<4x8x8xf32> -> vector<4x8x8xf32>
    "tpu.trace_stop"() : () -> ()
    %19 = arith.addf %15, %18 : vector<4x8x8xf32>
    %c0_31 = arith.constant 0 : index
    %c0_32 = arith.constant 0 : index
    %c0_33 = arith.constant 0 : index
    %20 = vector.load %arg6[%c0_31, %c0_32, %c0_33] : memref<4x8x8xf32, #tpu.memory_space<vmem>>, vector<4x8x8xf32>
    tpu.vector_store %arg6[%c0_31, %c0_32, %c0_33], %19 {strides = array<i32>} : memref<4x8x8xf32, #tpu.memory_space<vmem>>, vector<4x8x8xf32>,
    %c0_34 = arith.constant 0 : index
    %c0_35 = arith.constant 0 : index
    %c0_36 = arith.constant 0 : index
    %c16_37 = arith.constant 16 : index
    %21 = vector.load %arg1[%c0_34, %c0_35, %c0_36, %c16_37] : memref<2x4x8x32xf32, #tpu.memory_space<vmem>>, vector<1x4x8x16xf32>
    %22 = vector.shape_cast %21 : vector<1x4x8x16xf32> to vector<4x8x16xf32>
    %c0_38 = arith.constant 0 : index
    %c0_39 = arith.constant 0 : index
    %c0_40 = arith.constant 0 : index
    %23 = vector.load %arg6[%c0_38, %c0_39, %c0_40] : memref<4x8x8xf32, #tpu.memory_space<vmem>>, vector<4x8x8xf32>
    %c2 = arith.constant 2 : index
    %c0_41 = arith.constant 0 : index
    %c0_42 = arith.constant 0 : index
    %c0_43 = arith.constant 0 : index
    %24 = vector.load %arg3[%c2, %c0_41, %c0_42, %c0_43] : memref<4x4x16x8xf32, #tpu.memory_space<vmem>>, vector<1x4x16x8xf32>
    %25 = vector.shape_cast %24 : vector<1x4x16x8xf32> to vector<4x16x8xf32>
    "tpu.trace_start"() <{level = 10 : i32, message = "ciw,cwj->cij"}> : () -> ()
    %cst_44 = arith.constant dense<0.000000e+00> : vector<4x8x8xf32>
    %26 = tpu.matmul %22, %25, %cst_44 {dimension_numbers = #tpu.dot_dimension_numbers<[2], [1], [1], [2], [0, 0, 0, 1, 1, 2], [0], [0]>} : vector<4x8x16xf32>, vector<4x16x8xf32>, vector<4x8x8xf32> -> vector<4x8x8xf32>
    "tpu.trace_stop"() : () -> ()
    %27 = arith.addf %23, %26 : vector<4x8x8xf32>
    %c0_45 = arith.constant 0 : index
    %c0_46 = arith.constant 0 : index
    %c0_47 = arith.constant 0 : index
    %28 = vector.load %arg6[%c0_45, %c0_46, %c0_47] : memref<4x8x8xf32, #tpu.memory_space<vmem>>, vector<4x8x8xf32>
    tpu.vector_store %arg6[%c0_45, %c0_46, %c0_47], %27 {strides = array<i32>} : memref<4x8x8xf32, #tpu.memory_space<vmem>>, vector<4x8x8xf32>,
    %c0_48 = arith.constant 0 : index
    %c0_49 = arith.constant 0 : index
    %c1_50 = arith.constant 1 : index
    %c0_51 = arith.constant 0 : index
    %29 = vector.load %arg1[%c0_48, %c0_49, %c1_50, %c0_51] : memref<2x4x8x32xf32, #tpu.memory_space<vmem>>, vector<1x4x7x16xf32>
    %30 = vector.shape_cast %29 : vector<1x4x7x16xf32> to vector<4x7x16xf32>
    %c0_52 = arith.constant 0 : index
    %c0_53 = arith.constant 0 : index
    %c0_54 = arith.constant 0 : index
    %31 = vector.load %arg6[%c0_52, %c0_53, %c0_54] : memref<4x8x8xf32, #tpu.memory_space<vmem>>, vector<4x7x8xf32>
    %c3 = arith.constant 3 : index
    %c0_55 = arith.constant 0 : index
    %c0_56 = arith.constant 0 : index
    %c0_57 = arith.constant 0 : index
    %32 = vector.load %arg3[%c3, %c0_55, %c0_56, %c0_57] : memref<4x4x16x8xf32, #tpu.memory_space<vmem>>, vector<1x4x16x8xf32>
    %33 = vector.shape_cast %32 : vector<1x4x16x8xf32> to vector<4x16x8xf32>
    "tpu.trace_start"() <{level = 10 : i32, message = "ciw,cwj->cij"}> : () -> ()
    %cst_58 = arith.constant dense<0.000000e+00> : vector<4x7x8xf32>
    %34 = tpu.matmul %30, %33, %cst_58 {dimension_numbers = #tpu.dot_dimension_numbers<[2], [1], [1], [2], [0, 0, 0, 1, 1, 2], [0], [0]>} : vector<4x7x16xf32>, vector<4x16x8xf32>, vector<4x7x8xf32> -> vector<4x7x8xf32>
    "tpu.trace_stop"() : () -> ()
    %35 = arith.addf %31, %34 : vector<4x7x8xf32>
    %c0_59 = arith.constant 0 : index
    %c0_60 = arith.constant 0 : index
    %c0_61 = arith.constant 0 : index
    %36 = vector.load %arg6[%c0_59, %c0_60, %c0_61] : memref<4x8x8xf32, #tpu.memory_space<vmem>>, vector<4x7x8xf32>
    tpu.vector_store %arg6[%c0_59, %c0_60, %c0_61], %35 {strides = array<i32>} : memref<4x8x8xf32, #tpu.memory_space<vmem>>, vector<4x7x8xf32>,
    %cst_62 = arith.constant 0.000000e+00 : f32
    %37 = vector.broadcast %cst_62 : f32 to vector<4x8x32xf32>
    %c0_63 = arith.constant 0 : index
    %c0_64 = arith.constant 0 : index
    %c0_65 = arith.constant 0 : index
    %38 = vector.load %arg7[%c0_63, %c0_64, %c0_65] : memref<4x8x32xf32, #tpu.memory_space<vmem>>, vector<4x8x32xf32>
    tpu.vector_store %arg7[%c0_63, %c0_64, %c0_65], %37 {strides = array<i32>} : memref<4x8x32xf32, #tpu.memory_space<vmem>>, vector<4x8x32xf32>,
    %c0_66 = arith.constant 0 : index
    %c1_67 = arith.constant 1 : index
    %c0_68 = arith.constant 0 : index
    %39 = vector.load %arg6[%c0_66, %c1_67, %c0_68] : memref<4x8x8xf32, #tpu.memory_space<vmem>>, vector<4x7x8xf32>
    %c0_69 = arith.constant 0 : index
    %c0_70 = arith.constant 0 : index
    %c0_71 = arith.constant 0 : index
    %c0_72 = arith.constant 0 : index
    %40 = vector.load %arg4[%c0_69, %c0_70, %c0_71, %c0_72] : memref<4x4x8x16xf32, #tpu.memory_space<vmem>>, vector<1x4x8x16xf32>
    %41 = vector.shape_cast %40 : vector<1x4x8x16xf32> to vector<4x8x16xf32>
    "tpu.trace_start"() <{level = 10 : i32, message = "cij,cjn->cin"}> : () -> ()
    %cst_73 = arith.constant dense<0.000000e+00> : vector<4x7x16xf32>
    %42 = tpu.matmul %39, %41, %cst_73 {dimension_numbers = #tpu.dot_dimension_numbers<[2], [1], [1], [2], [0, 0, 0, 1, 1, 2], [0], [0]>} : vector<4x7x8xf32>, vector<4x8x16xf32>, vector<4x7x16xf32> -> vector<4x7x16xf32>
    "tpu.trace_stop"() : () -> ()
    %c0_74 = arith.constant 0 : index
    %c0_75 = arith.constant 0 : index
    %c16_76 = arith.constant 16 : index
    %43 = vector.load %arg7[%c0_74, %c0_75, %c16_76] : memref<4x8x32xf32, #tpu.memory_space<vmem>>, vector<4x7x16xf32>
    %44 = arith.addf %43, %42 : vector<4x7x16xf32>
    %c0_77 = arith.constant 0 : index
    %c0_78 = arith.constant 0 : index
    %c16_79 = arith.constant 16 : index
    %45 = vector.load %arg7[%c0_77, %c0_78, %c16_79] : memref<4x8x32xf32, #tpu.memory_space<vmem>>, vector<4x7x16xf32>
    tpu.vector_store %arg7[%c0_77, %c0_78, %c16_79], %44 {strides = array<i32>} : memref<4x8x32xf32, #tpu.memory_space<vmem>>, vector<4x7x16xf32>,
    %c0_80 = arith.constant 0 : index
    %c0_81 = arith.constant 0 : index
    %c0_82 = arith.constant 0 : index
    %46 = vector.load %arg6[%c0_80, %c0_81, %c0_82] : memref<4x8x8xf32, #tpu.memory_space<vmem>>, vector<4x8x8xf32>
    %c1_83 = arith.constant 1 : index
    %c0_84 = arith.constant 0 : index
    %c0_85 = arith.constant 0 : index
    %c0_86 = arith.constant 0 : index
    %47 = vector.load %arg4[%c1_83, %c0_84, %c0_85, %c0_86] : memref<4x4x8x16xf32, #tpu.memory_space<vmem>>, vector<1x4x8x16xf32>
    %48 = vector.shape_cast %47 : vector<1x4x8x16xf32> to vector<4x8x16xf32>
    "tpu.trace_start"() <{level = 10 : i32, message = "cij,cjn->cin"}> : () -> ()
    %cst_87 = arith.constant dense<0.000000e+00> : vector<4x8x16xf32>
    %49 = tpu.matmul %46, %48, %cst_87 {dimension_numbers = #tpu.dot_dimension_numbers<[2], [1], [1], [2], [0, 0, 0, 1, 1, 2], [0], [0]>} : vector<4x8x8xf32>, vector<4x8x16xf32>, vector<4x8x16xf32> -> vector<4x8x16xf32>
    "tpu.trace_stop"() : () -> ()
    %c0_88 = arith.constant 0 : index
    %c0_89 = arith.constant 0 : index
    %c0_90 = arith.constant 0 : index
    %50 = vector.load %arg7[%c0_88, %c0_89, %c0_90] : memref<4x8x32xf32, #tpu.memory_space<vmem>>, vector<4x8x16xf32>
    %51 = arith.addf %50, %49 : vector<4x8x16xf32>
    %c0_91 = arith.constant 0 : index
    %c0_92 = arith.constant 0 : index
    %c0_93 = arith.constant 0 : index
    %52 = vector.load %arg7[%c0_91, %c0_92, %c0_93] : memref<4x8x32xf32, #tpu.memory_space<vmem>>, vector<4x8x16xf32>
    tpu.vector_store %arg7[%c0_91, %c0_92, %c0_93], %51 {strides = array<i32>} : memref<4x8x32xf32, #tpu.memory_space<vmem>>, vector<4x8x16xf32>,
    %c0_94 = arith.constant 0 : index
    %c0_95 = arith.constant 0 : index
    %c0_96 = arith.constant 0 : index
    %53 = vector.load %arg6[%c0_94, %c0_95, %c0_96] : memref<4x8x8xf32, #tpu.memory_space<vmem>>, vector<4x8x8xf32>
    %c2_97 = arith.constant 2 : index
    %c0_98 = arith.constant 0 : index
    %c0_99 = arith.constant 0 : index
    %c0_100 = arith.constant 0 : index
    %54 = vector.load %arg4[%c2_97, %c0_98, %c0_99, %c0_100] : memref<4x4x8x16xf32, #tpu.memory_space<vmem>>, vector<1x4x8x16xf32>
    %55 = vector.shape_cast %54 : vector<1x4x8x16xf32> to vector<4x8x16xf32>
    "tpu.trace_start"() <{level = 10 : i32, message = "cij,cjn->cin"}> : () -> ()
    %cst_101 = arith.constant dense<0.000000e+00> : vector<4x8x16xf32>
    %56 = tpu.matmul %53, %55, %cst_101 {dimension_numbers = #tpu.dot_dimension_numbers<[2], [1], [1], [2], [0, 0, 0, 1, 1, 2], [0], [0]>} : vector<4x8x8xf32>, vector<4x8x16xf32>, vector<4x8x16xf32> -> vector<4x8x16xf32>
    "tpu.trace_stop"() : () -> ()
    %c0_102 = arith.constant 0 : index
    %c0_103 = arith.constant 0 : index
    %c16_104 = arith.constant 16 : index
    %57 = vector.load %arg7[%c0_102, %c0_103, %c16_104] : memref<4x8x32xf32, #tpu.memory_space<vmem>>, vector<4x8x16xf32>
    %58 = arith.addf %57, %56 : vector<4x8x16xf32>
    %c0_105 = arith.constant 0 : index
    %c0_106 = arith.constant 0 : index
    %c16_107 = arith.constant 16 : index
    %59 = vector.load %arg7[%c0_105, %c0_106, %c16_107] : memref<4x8x32xf32, #tpu.memory_space<vmem>>, vector<4x8x16xf32>
    tpu.vector_store %arg7[%c0_105, %c0_106, %c16_107], %58 {strides = array<i32>} : memref<4x8x32xf32, #tpu.memory_space<vmem>>, vector<4x8x16xf32>,
    %c0_108 = arith.constant 0 : index
    %c0_109 = arith.constant 0 : index
    %c0_110 = arith.constant 0 : index
    %60 = vector.load %arg6[%c0_108, %c0_109, %c0_110] : memref<4x8x8xf32, #tpu.memory_space<vmem>>, vector<4x7x8xf32>
    %c3_111 = arith.constant 3 : index
    %c0_112 = arith.constant 0 : index
    %c0_113 = arith.constant 0 : index
    %c0_114 = arith.constant 0 : index
    %61 = vector.load %arg4[%c3_111, %c0_112, %c0_113, %c0_114] : memref<4x4x8x16xf32, #tpu.memory_space<vmem>>, vector<1x4x8x16xf32>
    %62 = vector.shape_cast %61 : vector<1x4x8x16xf32> to vector<4x8x16xf32>
    "tpu.trace_start"() <{level = 10 : i32, message = "cij,cjn->cin"}> : () -> ()
    %cst_115 = arith.constant dense<0.000000e+00> : vector<4x7x16xf32>
    %63 = tpu.matmul %60, %62, %cst_115 {dimension_numbers = #tpu.dot_dimension_numbers<[2], [1], [1], [2], [0, 0, 0, 1, 1, 2], [0], [0]>} : vector<4x7x8xf32>, vector<4x8x16xf32>, vector<4x7x16xf32> -> vector<4x7x16xf32>
    "tpu.trace_stop"() : () -> ()
    %c0_116 = arith.constant 0 : index
    %c1_117 = arith.constant 1 : index
    %c0_118 = arith.constant 0 : index
    %64 = vector.load %arg7[%c0_116, %c1_117, %c0_118] : memref<4x8x32xf32, #tpu.memory_space<vmem>>, vector<4x7x16xf32>
    %65 = arith.addf %64, %63 : vector<4x7x16xf32>
    %c0_119 = arith.constant 0 : index
    %c1_120 = arith.constant 1 : index
    %c0_121 = arith.constant 0 : index
    %66 = vector.load %arg7[%c0_119, %c1_120, %c0_121] : memref<4x8x32xf32, #tpu.memory_space<vmem>>, vector<4x7x16xf32>
    tpu.vector_store %arg7[%c0_119, %c1_120, %c0_121], %65 {strides = array<i32>} : memref<4x8x32xf32, #tpu.memory_space<vmem>>, vector<4x7x16xf32>,
    %c0_122 = arith.constant 0 : index
    %c0_123 = arith.constant 0 : index
    %c0_124 = arith.constant 0 : index
    %c0_125 = arith.constant 0 : index
    %67 = vector.load %arg1[%c0_122, %c0_123, %c0_124, %c0_125] : memref<2x4x8x32xf32, #tpu.memory_space<vmem>>, vector<1x4x8x32xf32>
    %68 = vector.shape_cast %67 : vector<1x4x8x32xf32> to vector<4x8x32xf32>
    %c0_126 = arith.constant 0 : index
    %c0_127 = arith.constant 0 : index
    %c0_128 = arith.constant 0 : index
    %69 = vector.load %arg7[%c0_126, %c0_127, %c0_128] : memref<4x8x32xf32, #tpu.memory_space<vmem>>, vector<4x8x32xf32>
    %70 = arith.subf %68, %69 : vector<4x8x32xf32>
    %c0_129 = arith.constant 0 : index
    %c0_130 = arith.constant 0 : index
    %c0_131 = arith.constant 0 : index
    %c0_132 = arith.constant 0 : index
    %71 = vector.load %arg5[%c0_129, %c0_130, %c0_131, %c0_132] : memref<2x4x8x32xf32, #tpu.memory_space<vmem>>, vector<1x4x8x32xf32>
    %72 = vector.shape_cast %71 : vector<1x4x8x32xf32> to vector<4x8x32xf32>
    %73 = vector.shape_cast %70 : vector<4x8x32xf32> to vector<1x4x8x32xf32>
    tpu.vector_store %arg5[%c0_129, %c0_130, %c0_131, %c0_132], %73 {strides = array<i32>} : memref<2x4x8x32xf32, #tpu.memory_space<vmem>>, vector<1x4x8x32xf32>,
    %c1_133 = arith.constant 1 : index
    %c0_134 = arith.constant 0 : index
    %c0_135 = arith.constant 0 : index
    %c0_136 = arith.constant 0 : index
    %74 = vector.load %arg2[%c1_133, %c0_134, %c0_135, %c0_136] : memref<2x4x8x8xf32, #tpu.memory_space<vmem>>, vector<1x4x8x8xf32>
    %75 = vector.shape_cast %74 : vector<1x4x8x8xf32> to vector<4x8x8xf32>
    %cst_137 = arith.constant 0.000000e+00 : f32
    %76 = vector.broadcast %cst_137 : f32 to vector<4x8x8xf32>
    %77 = arith.subf %76, %75 : vector<4x8x8xf32>
    %c0_138 = arith.constant 0 : index
    %c0_139 = arith.constant 0 : index
    %c0_140 = arith.constant 0 : index
    %78 = vector.load %arg6[%c0_138, %c0_139, %c0_140] : memref<4x8x8xf32, #tpu.memory_space<vmem>>, vector<4x8x8xf32>
    tpu.vector_store %arg6[%c0_138, %c0_139, %c0_140], %77 {strides = array<i32>} : memref<4x8x8xf32, #tpu.memory_space<vmem>>, vector<4x8x8xf32>,
    %c1_141 = arith.constant 1 : index
    %c0_142 = arith.constant 0 : index
    %c0_143 = arith.constant 0 : index
    %c16_144 = arith.constant 16 : index
    %79 = vector.load %arg1[%c1_141, %c0_142, %c0_143, %c16_144] : memref<2x4x8x32xf32, #tpu.memory_space<vmem>>, vector<1x4x7x16xf32>
    %80 = vector.shape_cast %79 : vector<1x4x7x16xf32> to vector<4x7x16xf32>
    %c0_145 = arith.constant 0 : index
    %c1_146 = arith.constant 1 : index
    %c0_147 = arith.constant 0 : index
    %81 = vector.load %arg6[%c0_145, %c1_146, %c0_147] : memref<4x8x8xf32, #tpu.memory_space<vmem>>, vector<4x7x8xf32>
    %c0_148 = arith.constant 0 : index
    %c0_149 = arith.constant 0 : index
    %c0_150 = arith.constant 0 : index
    %c0_151 = arith.constant 0 : index
    %82 = vector.load %arg3[%c0_148, %c0_149, %c0_150, %c0_151] : memref<4x4x16x8xf32, #tpu.memory_space<vmem>>, vector<1x4x16x8xf32>
    %83 = vector.shape_cast %82 : vector<1x4x16x8xf32> to vector<4x16x8xf32>
    "tpu.trace_start"() <{level = 10 : i32, message = "ciw,cwj->cij"}> : () -> ()
    %cst_152 = arith.constant dense<0.000000e+00> : vector<4x7x8xf32>
    %84 = tpu.matmul %80, %83, %cst_152 {dimension_numbers = #tpu.dot_dimension_numbers<[2], [1], [1], [2], [0, 0, 0, 1, 1, 2], [0], [0]>} : vector<4x7x16xf32>, vector<4x16x8xf32>, vector<4x7x8xf32> -> vector<4x7x8xf32>
    "tpu.trace_stop"() : () -> ()
    %85 = arith.addf %81, %84 : vector<4x7x8xf32>
    %c0_153 = arith.constant 0 : index
    %c1_154 = arith.constant 1 : index
    %c0_155 = arith.constant 0 : index
    %86 = vector.load %arg6[%c0_153, %c1_154, %c0_155] : memref<4x8x8xf32, #tpu.memory_space<vmem>>, vector<4x7x8xf32>
    tpu.vector_store %arg6[%c0_153, %c1_154, %c0_155], %85 {strides = array<i32>} : memref<4x8x8xf32, #tpu.memory_space<vmem>>, vector<4x7x8xf32>,
    %c1_156 = arith.constant 1 : index
    %c0_157 = arith.constant 0 : index
    %c0_158 = arith.constant 0 : index
    %c0_159 = arith.constant 0 : index
    %87 = vector.load %arg1[%c1_156, %c0_157, %c0_158, %c0_159] : memref<2x4x8x32xf32, #tpu.memory_space<vmem>>, vector<1x4x8x16xf32>
    %88 = vector.shape_cast %87 : vector<1x4x8x16xf32> to vector<4x8x16xf32>
    %c0_160 = arith.constant 0 : index
    %c0_161 = arith.constant 0 : index
    %c0_162 = arith.constant 0 : index
    %89 = vector.load %arg6[%c0_160, %c0_161, %c0_162] : memref<4x8x8xf32, #tpu.memory_space<vmem>>, vector<4x8x8xf32>
    %c1_163 = arith.constant 1 : index
    %c0_164 = arith.constant 0 : index
    %c0_165 = arith.constant 0 : index
    %c0_166 = arith.constant 0 : index
    %90 = vector.load %arg3[%c1_163, %c0_164, %c0_165, %c0_166] : memref<4x4x16x8xf32, #tpu.memory_space<vmem>>, vector<1x4x16x8xf32>
    %91 = vector.shape_cast %90 : vector<1x4x16x8xf32> to vector<4x16x8xf32>
    "tpu.trace_start"() <{level = 10 : i32, message = "ciw,cwj->cij"}> : () -> ()
    %cst_167 = arith.constant dense<0.000000e+00> : vector<4x8x8xf32>
    %92 = tpu.matmul %88, %91, %cst_167 {dimension_numbers = #tpu.dot_dimension_numbers<[2], [1], [1], [2], [0, 0, 0, 1, 1, 2], [0], [0]>} : vector<4x8x16xf32>, vector<4x16x8xf32>, vector<4x8x8xf32> -> vector<4x8x8xf32>
    "tpu.trace_stop"() : () -> ()
    %93 = arith.addf %89, %92 : vector<4x8x8xf32>
    %c0_168 = arith.constant 0 : index
    %c0_169 = arith.constant 0 : index
    %c0_170 = arith.constant 0 : index
    %94 = vector.load %arg6[%c0_168, %c0_169, %c0_170] : memref<4x8x8xf32, #tpu.memory_space<vmem>>, vector<4x8x8xf32>
    tpu.vector_store %arg6[%c0_168, %c0_169, %c0_170], %93 {strides = array<i32>} : memref<4x8x8xf32, #tpu.memory_space<vmem>>, vector<4x8x8xf32>,
    %c1_171 = arith.constant 1 : index
    %c0_172 = arith.constant 0 : index
    %c0_173 = arith.constant 0 : index
    %c16_174 = arith.constant 16 : index
    %95 = vector.load %arg1[%c1_171, %c0_172, %c0_173, %c16_174] : memref<2x4x8x32xf32, #tpu.memory_space<vmem>>, vector<1x4x8x16xf32>
    %96 = vector.shape_cast %95 : vector<1x4x8x16xf32> to vector<4x8x16xf32>
    %c0_175 = arith.constant 0 : index
    %c0_176 = arith.constant 0 : index
    %c0_177 = arith.constant 0 : index
    %97 = vector.load %arg6[%c0_175, %c0_176, %c0_177] : memref<4x8x8xf32, #tpu.memory_space<vmem>>, vector<4x8x8xf32>
    %c2_178 = arith.constant 2 : index
    %c0_179 = arith.constant 0 : index
    %c0_180 = arith.constant 0 : index
    %c0_181 = arith.constant 0 : index
    %98 = vector.load %arg3[%c2_178, %c0_179, %c0_180, %c0_181] : memref<4x4x16x8xf32, #tpu.memory_space<vmem>>, vector<1x4x16x8xf32>
    %99 = vector.shape_cast %98 : vector<1x4x16x8xf32> to vector<4x16x8xf32>
    "tpu.trace_start"() <{level = 10 : i32, message = "ciw,cwj->cij"}> : () -> ()
    %cst_182 = arith.constant dense<0.000000e+00> : vector<4x8x8xf32>
    %100 = tpu.matmul %96, %99, %cst_182 {dimension_numbers = #tpu.dot_dimension_numbers<[2], [1], [1], [2], [0, 0, 0, 1, 1, 2], [0], [0]>} : vector<4x8x16xf32>, vector<4x16x8xf32>, vector<4x8x8xf32> -> vector<4x8x8xf32>
    "tpu.trace_stop"() : () -> ()
    %101 = arith.addf %97, %100 : vector<4x8x8xf32>
    %c0_183 = arith.constant 0 : index
    %c0_184 = arith.constant 0 : index
    %c0_185 = arith.constant 0 : index
    %102 = vector.load %arg6[%c0_183, %c0_184, %c0_185] : memref<4x8x8xf32, #tpu.memory_space<vmem>>, vector<4x8x8xf32>
    tpu.vector_store %arg6[%c0_183, %c0_184, %c0_185], %101 {strides = array<i32>} : memref<4x8x8xf32, #tpu.memory_space<vmem>>, vector<4x8x8xf32>,
    %c1_186 = arith.constant 1 : index
    %c0_187 = arith.constant 0 : index
    %c1_188 = arith.constant 1 : index
    %c0_189 = arith.constant 0 : index
    %103 = vector.load %arg1[%c1_186, %c0_187, %c1_188, %c0_189] : memref<2x4x8x32xf32, #tpu.memory_space<vmem>>, vector<1x4x7x16xf32>
    %104 = vector.shape_cast %103 : vector<1x4x7x16xf32> to vector<4x7x16xf32>
    %c0_190 = arith.constant 0 : index
    %c0_191 = arith.constant 0 : index
    %c0_192 = arith.constant 0 : index
    %105 = vector.load %arg6[%c0_190, %c0_191, %c0_192] : memref<4x8x8xf32, #tpu.memory_space<vmem>>, vector<4x7x8xf32>
    %c3_193 = arith.constant 3 : index
    %c0_194 = arith.constant 0 : index
    %c0_195 = arith.constant 0 : index
    %c0_196 = arith.constant 0 : index
    %106 = vector.load %arg3[%c3_193, %c0_194, %c0_195, %c0_196] : memref<4x4x16x8xf32, #tpu.memory_space<vmem>>, vector<1x4x16x8xf32>
    %107 = vector.shape_cast %106 : vector<1x4x16x8xf32> to vector<4x16x8xf32>
    "tpu.trace_start"() <{level = 10 : i32, message = "ciw,cwj->cij"}> : () -> ()
    %cst_197 = arith.constant dense<0.000000e+00> : vector<4x7x8xf32>
    %108 = tpu.matmul %104, %107, %cst_197 {dimension_numbers = #tpu.dot_dimension_numbers<[2], [1], [1], [2], [0, 0, 0, 1, 1, 2], [0], [0]>} : vector<4x7x16xf32>, vector<4x16x8xf32>, vector<4x7x8xf32> -> vector<4x7x8xf32>
    "tpu.trace_stop"() : () -> ()
    %109 = arith.addf %105, %108 : vector<4x7x8xf32>
    %c0_198 = arith.constant 0 : index
    %c0_199 = arith.constant 0 : index
    %c0_200 = arith.constant 0 : index
    %110 = vector.load %arg6[%c0_198, %c0_199, %c0_200] : memref<4x8x8xf32, #tpu.memory_space<vmem>>, vector<4x7x8xf32>
    tpu.vector_store %arg6[%c0_198, %c0_199, %c0_200], %109 {strides = array<i32>} : memref<4x8x8xf32, #tpu.memory_space<vmem>>, vector<4x7x8xf32>,
    %cst_201 = arith.constant 0.000000e+00 : f32
    %111 = vector.broadcast %cst_201 : f32 to vector<4x8x32xf32>
    %c0_202 = arith.constant 0 : index
    %c0_203 = arith.constant 0 : index
    %c0_204 = arith.constant 0 : index
    %112 = vector.load %arg7[%c0_202, %c0_203, %c0_204] : memref<4x8x32xf32, #tpu.memory_space<vmem>>, vector<4x8x32xf32>
    tpu.vector_store %arg7[%c0_202, %c0_203, %c0_204], %111 {strides = array<i32>} : memref<4x8x32xf32, #tpu.memory_space<vmem>>, vector<4x8x32xf32>,
    %c0_205 = arith.constant 0 : index
    %c1_206 = arith.constant 1 : index
    %c0_207 = arith.constant 0 : index
    %113 = vector.load %arg6[%c0_205, %c1_206, %c0_207] : memref<4x8x8xf32, #tpu.memory_space<vmem>>, vector<4x7x8xf32>
    %c0_208 = arith.constant 0 : index
    %c0_209 = arith.constant 0 : index
    %c0_210 = arith.constant 0 : index
    %c0_211 = arith.constant 0 : index
    %114 = vector.load %arg4[%c0_208, %c0_209, %c0_210, %c0_211] : memref<4x4x8x16xf32, #tpu.memory_space<vmem>>, vector<1x4x8x16xf32>
    %115 = vector.shape_cast %114 : vector<1x4x8x16xf32> to vector<4x8x16xf32>
    "tpu.trace_start"() <{level = 10 : i32, message = "cij,cjn->cin"}> : () -> ()
    %cst_212 = arith.constant dense<0.000000e+00> : vector<4x7x16xf32>
    %116 = tpu.matmul %113, %115, %cst_212 {dimension_numbers = #tpu.dot_dimension_numbers<[2], [1], [1], [2], [0, 0, 0, 1, 1, 2], [0], [0]>} : vector<4x7x8xf32>, vector<4x8x16xf32>, vector<4x7x16xf32> -> vector<4x7x16xf32>
    "tpu.trace_stop"() : () -> ()
    %c0_213 = arith.constant 0 : index
    %c0_214 = arith.constant 0 : index
    %c16_215 = arith.constant 16 : index
    %117 = vector.load %arg7[%c0_213, %c0_214, %c16_215] : memref<4x8x32xf32, #tpu.memory_space<vmem>>, vector<4x7x16xf32>
    %118 = arith.addf %117, %116 : vector<4x7x16xf32>
    %c0_216 = arith.constant 0 : index
    %c0_217 = arith.constant 0 : index
    %c16_218 = arith.constant 16 : index
    %119 = vector.load %arg7[%c0_216, %c0_217, %c16_218] : memref<4x8x32xf32, #tpu.memory_space<vmem>>, vector<4x7x16xf32>
    tpu.vector_store %arg7[%c0_216, %c0_217, %c16_218], %118 {strides = array<i32>} : memref<4x8x32xf32, #tpu.memory_space<vmem>>, vector<4x7x16xf32>,
    %c0_219 = arith.constant 0 : index
    %c0_220 = arith.constant 0 : index
    %c0_221 = arith.constant 0 : index
    %120 = vector.load %arg6[%c0_219, %c0_220, %c0_221] : memref<4x8x8xf32, #tpu.memory_space<vmem>>, vector<4x8x8xf32>
    %c1_222 = arith.constant 1 : index
    %c0_223 = arith.constant 0 : index
    %c0_224 = arith.constant 0 : index
    %c0_225 = arith.constant 0 : index
    %121 = vector.load %arg4[%c1_222, %c0_223, %c0_224, %c0_225] : memref<4x4x8x16xf32, #tpu.memory_space<vmem>>, vector<1x4x8x16xf32>
    %122 = vector.shape_cast %121 : vector<1x4x8x16xf32> to vector<4x8x16xf32>
    "tpu.trace_start"() <{level = 10 : i32, message = "cij,cjn->cin"}> : () -> ()
    %cst_226 = arith.constant dense<0.000000e+00> : vector<4x8x16xf32>
    %123 = tpu.matmul %120, %122, %cst_226 {dimension_numbers = #tpu.dot_dimension_numbers<[2], [1], [1], [2], [0, 0, 0, 1, 1, 2], [0], [0]>} : vector<4x8x8xf32>, vector<4x8x16xf32>, vector<4x8x16xf32> -> vector<4x8x16xf32>
    "tpu.trace_stop"() : () -> ()
    %c0_227 = arith.constant 0 : index
    %c0_228 = arith.constant 0 : index
    %c0_229 = arith.constant 0 : index
    %124 = vector.load %arg7[%c0_227, %c0_228, %c0_229] : memref<4x8x32xf32, #tpu.memory_space<vmem>>, vector<4x8x16xf32>
    %125 = arith.addf %124, %123 : vector<4x8x16xf32>
    %c0_230 = arith.constant 0 : index
    %c0_231 = arith.constant 0 : index
    %c0_232 = arith.constant 0 : index
    %126 = vector.load %arg7[%c0_230, %c0_231, %c0_232] : memref<4x8x32xf32, #tpu.memory_space<vmem>>, vector<4x8x16xf32>
    tpu.vector_store %arg7[%c0_230, %c0_231, %c0_232], %125 {strides = array<i32>} : memref<4x8x32xf32, #tpu.memory_space<vmem>>, vector<4x8x16xf32>,
    %c0_233 = arith.constant 0 : index
    %c0_234 = arith.constant 0 : index
    %c0_235 = arith.constant 0 : index
    %127 = vector.load %arg6[%c0_233, %c0_234, %c0_235] : memref<4x8x8xf32, #tpu.memory_space<vmem>>, vector<4x8x8xf32>
    %c2_236 = arith.constant 2 : index
    %c0_237 = arith.constant 0 : index
    %c0_238 = arith.constant 0 : index
    %c0_239 = arith.constant 0 : index
    %128 = vector.load %arg4[%c2_236, %c0_237, %c0_238, %c0_239] : memref<4x4x8x16xf32, #tpu.memory_space<vmem>>, vector<1x4x8x16xf32>
    %129 = vector.shape_cast %128 : vector<1x4x8x16xf32> to vector<4x8x16xf32>
    "tpu.trace_start"() <{level = 10 : i32, message = "cij,cjn->cin"}> : () -> ()
    %cst_240 = arith.constant dense<0.000000e+00> : vector<4x8x16xf32>
    %130 = tpu.matmul %127, %129, %cst_240 {dimension_numbers = #tpu.dot_dimension_numbers<[2], [1], [1], [2], [0, 0, 0, 1, 1, 2], [0], [0]>} : vector<4x8x8xf32>, vector<4x8x16xf32>, vector<4x8x16xf32> -> vector<4x8x16xf32>
    "tpu.trace_stop"() : () -> ()
    %c0_241 = arith.constant 0 : index
    %c0_242 = arith.constant 0 : index
    %c16_243 = arith.constant 16 : index
    %131 = vector.load %arg7[%c0_241, %c0_242, %c16_243] : memref<4x8x32xf32, #tpu.memory_space<vmem>>, vector<4x8x16xf32>
    %132 = arith.addf %131, %130 : vector<4x8x16xf32>
    %c0_244 = arith.constant 0 : index
    %c0_245 = arith.constant 0 : index
    %c16_246 = arith.constant 16 : index
    %133 = vector.load %arg7[%c0_244, %c0_245, %c16_246] : memref<4x8x32xf32, #tpu.memory_space<vmem>>, vector<4x8x16xf32>
    tpu.vector_store %arg7[%c0_244, %c0_245, %c16_246], %132 {strides = array<i32>} : memref<4x8x32xf32, #tpu.memory_space<vmem>>, vector<4x8x16xf32>,
    %c0_247 = arith.constant 0 : index
    %c0_248 = arith.constant 0 : index
    %c0_249 = arith.constant 0 : index
    %134 = vector.load %arg6[%c0_247, %c0_248, %c0_249] : memref<4x8x8xf32, #tpu.memory_space<vmem>>, vector<4x7x8xf32>
    %c3_250 = arith.constant 3 : index
    %c0_251 = arith.constant 0 : index
    %c0_252 = arith.constant 0 : index
    %c0_253 = arith.constant 0 : index
    %135 = vector.load %arg4[%c3_250, %c0_251, %c0_252, %c0_253] : memref<4x4x8x16xf32, #tpu.memory_space<vmem>>, vector<1x4x8x16xf32>
    %136 = vector.shape_cast %135 : vector<1x4x8x16xf32> to vector<4x8x16xf32>
    "tpu.trace_start"() <{level = 10 : i32, message = "cij,cjn->cin"}> : () -> ()
    %cst_254 = arith.constant dense<0.000000e+00> : vector<4x7x16xf32>
    %137 = tpu.matmul %134, %136, %cst_254 {dimension_numbers = #tpu.dot_dimension_numbers<[2], [1], [1], [2], [0, 0, 0, 1, 1, 2], [0], [0]>} : vector<4x7x8xf32>, vector<4x8x16xf32>, vector<4x7x16xf32> -> vector<4x7x16xf32>
    "tpu.trace_stop"() : () -> ()
    %c0_255 = arith.constant 0 : index
    %c1_256 = arith.constant 1 : index
    %c0_257 = arith.constant 0 : index
    %138 = vector.load %arg7[%c0_255, %c1_256, %c0_257] : memref<4x8x32xf32, #tpu.memory_space<vmem>>, vector<4x7x16xf32>
    %139 = arith.addf %138, %137 : vector<4x7x16xf32>
    %c0_258 = arith.constant 0 : index
    %c1_259 = arith.constant 1 : index
    %c0_260 = arith.constant 0 : index
    %140 = vector.load %arg7[%c0_258, %c1_259, %c0_260] : memref<4x8x32xf32, #tpu.memory_space<vmem>>, vector<4x7x16xf32>
    tpu.vector_store %arg7[%c0_258, %c1_259, %c0_260], %139 {strides = array<i32>} : memref<4x8x32xf32, #tpu.memory_space<vmem>>, vector<4x7x16xf32>,
    %c1_261 = arith.constant 1 : index
    %c0_262 = arith.constant 0 : index
    %c0_263 = arith.constant 0 : index
    %c0_264 = arith.constant 0 : index
    %141 = vector.load %arg1[%c1_261, %c0_262, %c0_263, %c0_264] : memref<2x4x8x32xf32, #tpu.memory_space<vmem>>, vector<1x4x8x32xf32>
    %142 = vector.shape_cast %141 : vector<1x4x8x32xf32> to vector<4x8x32xf32>
    %c0_265 = arith.constant 0 : index
    %c0_266 = arith.constant 0 : index
    %c0_267 = arith.constant 0 : index
    %143 = vector.load %arg7[%c0_265, %c0_266, %c0_267] : memref<4x8x32xf32, #tpu.memory_space<vmem>>, vector<4x8x32xf32>
    %144 = arith.subf %142, %143 : vector<4x8x32xf32>
    %c1_268 = arith.constant 1 : index
    %c0_269 = arith.constant 0 : index
    %c0_270 = arith.constant 0 : index
    %c0_271 = arith.constant 0 : index
    %145 = vector.load %arg5[%c1_268, %c0_269, %c0_270, %c0_271] : memref<2x4x8x32xf32, #tpu.memory_space<vmem>>, vector<1x4x8x32xf32>
    %146 = vector.shape_cast %145 : vector<1x4x8x32xf32> to vector<4x8x32xf32>
    %147 = vector.shape_cast %144 : vector<4x8x32xf32> to vector<1x4x8x32xf32>
    tpu.vector_store %arg5[%c1_268, %c0_269, %c0_270, %c0_271], %147 {strides = array<i32>} : memref<2x4x8x32xf32, #tpu.memory_space<vmem>>, vector<1x4x8x32xf32>,
    return
  }
  func.func @transform_0(%arg0: i32) -> (i32, i32, i32, i32) {
    %c0_i32 = arith.constant 0 : i32
    %c0_i32_0 = arith.constant 0 : i32
    %c0_i32_1 = arith.constant 0 : i32
    %c0_i32_2 = arith.constant 0 : i32
    return %arg0, %c0_i32, %c0_i32_0, %c0_i32_1 : i32, i32, i32, i32
  }
  func.func @transform_1(%arg0: i32) -> (i32, i32, i32, i32) {
    %c0_i32 = arith.constant 0 : i32
    %c0_i32_0 = arith.constant 0 : i32
    %c0_i32_1 = arith.constant 0 : i32
    %c0_i32_2 = arith.constant 0 : i32
    return %arg0, %c0_i32, %c0_i32_0, %c0_i32_1 : i32, i32, i32, i32
  }
  func.func @transform_2(%arg0: i32) -> (i32, i32, i32, i32) {
    %c0_i32 = arith.constant 0 : i32
    %c0_i32_0 = arith.constant 0 : i32
    %c0_i32_1 = arith.constant 0 : i32
    %c0_i32_2 = arith.constant 0 : i32
    %c0_i32_3 = arith.constant 0 : i32
    return %c0_i32, %c0_i32_0, %c0_i32_1, %c0_i32_2 : i32, i32, i32, i32
  }
  func.func @transform_3(%arg0: i32) -> (i32, i32, i32, i32) {
    %c0_i32 = arith.constant 0 : i32
    %c0_i32_0 = arith.constant 0 : i32
    %c0_i32_1 = arith.constant 0 : i32
    %c0_i32_2 = arith.constant 0 : i32
    %c0_i32_3 = arith.constant 0 : i32
    return %c0_i32, %c0_i32_0, %c0_i32_1, %c0_i32_2 : i32, i32, i32, i32
  }
  func.func @transform_4(%arg0: i32) -> (i32, i32, i32, i32) {
    %c0_i32 = arith.constant 0 : i32
    %c0_i32_0 = arith.constant 0 : i32
    %c0_i32_1 = arith.constant 0 : i32
    %c0_i32_2 = arith.constant 0 : i32
    return %arg0, %c0_i32, %c0_i32_0, %c0_i32_1 : i32, i32, i32, i32
  }
}

</mosaic_0001>

<bundles_post_ra>
// kernel: stage_block_forward.1
= control target key start
LH: loop header
LB: loop body
LE: loop exit
PB: predicated region body
PF: predicated region fallthrough
CT: control target
= control target key end

     0   :  { %s2531_s15 = smov 0   ;;  %s3190_s0 = inlined_call_operand.vmem [shape: f32[4,4,8,32], index: 0, kind: input, shape index: {}]   ;;  %s3191_s1 = inlined_call_operand.vmem [shape: f32[4,4,8,8], index: 1, kind: input, shape index: {}]   ;;  %s3192_s2 = inlined_call_operand.vmem [shape: f32[4,4,16,8], index: 2, kind: input, shape index: {}]   ;;  %s3193_s3 = inlined_call_operand.vmem [shape: f32[4,4,8,16], index: 3, kind: input, shape index: {}]   ;;  %s3194_s4 = inlined_call_operand.vmem [shape: f32[4,4,8,32], index: 4, kind: output, shape index: {}]  }
   0x1 LB: > { %s2301_s16 = sadd.s32 4294967295, %s2501_s15   ;;  %p2305_p0 = scmp.ge.s32.totalorder %s2501_s15, 1  ;;  %s2501_s15 = sphi %s2531_s15, %s14_s15  }
   0x2   : > { %p176_p1 = scmp.lt.s32.totalorder %s2501_s15, 3 }
   0x4   : > { %p177_p2 = pnand %p2305_p0, %p176_p1 }
   0x5   : > { %s2306_s17 = sshll.u32 (!%p177_p2), %s2301_s16, 1  ;;  %s2503_s30 = smov (!%p177_p2), 112  }
   0x6   : > { %180 = sbr.rel (%p177_p2) target bundleno = 804 (0x324), region = 36  ;;  %p211_p3 = scmp.lt.s32.totalorder (!%p177_p2), %s2306_s17, 3 }
   0x7   : > { %s2504_s8 = smov (!%p177_p2), 16  }
   0xb   : > { %v2542_v0 = vld [vmem:[%s3192_s2 + $0x8] sm:$0xff]  ;;  %v2552_v2 = vld [vmem:[%s3192_s2] sm:$0xff]  ;;  %s3196_s17 = smov (!%p211_p3, %s2306_s17), 3  ;;  %v2599_v12 = vld [vmem:[%s3192_s2 + $0x18] sm:$0xff]  ;;  %vm263_vm0 = vcmask 130048   ;;  %vm239_vm1 = vcmask 64512  }
   0xc   : > { %v2547_v1 = vld [vmem:[%s3192_s2 + $0x28] sm:$0xff]  ;;  %280 = vmatpush.msra.mxu0 %v2542_v0  ;;  %v2559_v3 = vld [vmem:[%s3192_s2 + $0x20] sm:$0xff]  ;;  %s2563_s26 = sshll.u32 %s3196_s17, 5  ;;  %v2604_v13 = vld [vmem:[%s3192_s2 + $0x38] sm:$0xff]  ;;  %305 = vmatpush.msra.mxu1 %v2599_v12  ;;  %vm365_vm2 = vcmask 63488   ;;  %vm729_vm3 = vcmask 261120  }
   0xd   : > { %330 = vmatpush.msra.mxu2 %v2547_v1  ;;  %s2569_s29 = scalar_lea.vmem %s3190_s0, %s2563_s26  ;;  %v2609_v14 = vld [vmem:[%s3192_s2 + $0x10] sm:$0xff]  ;;  %355 = vmatpush.msra.mxu3 %v2604_v13  ;;  %v2621_v16 = vld [vmem:[%s3192_s2 + $0x48] sm:$0xff]  ;;  %v2635_v18 = vld [vmem:[%s3192_s2 + $0x40] sm:$0xff]  ;;  %s2696_s18 = scalar_lea.vmem %s3191_s1, %s2563_s26  ;;  %vm858_vm4 = vcmask 260224   ;;  %vm1101_vm5 = vcmask 261248   ;;  %vm1215_vm6 = vcmask 129024  }
   0xe   : > { %281 = vmatpush.msra.mxu0 %v2552_v2  ;;  %v246_v4 = vld [vmem:[%s2569_s29 + $0x10] sm:$0x7f]  ;;  %v244_v5 = vld [vmem:[%s2569_s29] sm:$0x7f]  ;;  %v247_v7 = vld [vmem:[%s2569_s29 + $0x18] sm:$0x7f]  ;;  %306 = vmatpush.msra.mxu1 %v2609_v14  ;;  %s3125_s10 = scalar_lea.vmem %s3194_s4, %s2563_s26 }
   0xf   : > { %331 = vmatpush.msra.mxu2 %v2559_v3  ;;  %312 = vrot.lane.b32.xlu0 %v246_v4, %s2503_s30  ;;  %v2576_v6 = vld [vmem:[%s2569_s29 + $0x10] sm:$0xff]  ;;  %v245_v8 = vld [vmem:[%s2569_s29 + $0x8] sm:$0x7f]  ;;  %v2583_v9 = vld [vmem:[%s2569_s29 + $0x18] sm:$0xff] }
  0x10   : > { %261 = vrot.lane.b32.xlu1 %v244_v5, %s2503_s30  ;;  %555 = vrot.lane.b32.xlu2 %v2576_v6, %s2503_s30  ;;  %v487_v10 = vld [vmem:[%s2569_s29] sm:$0xff]  ;;  %v2591_v11 = vld [vmem:[%s2569_s29 + $0x8] sm:$0xff] }
  0x11   : > { %v2616_v15 = vld [vmem:[%s3192_s2 + $0x30] sm:$0xff]  ;;  %v2626_v17 = vld [vmem:[%s3192_s2 + $0x68] sm:$0xff]  ;;  %404 = vmatpush.msrb.mxu0 %v2621_v16  ;;  %v2640_v19 = vld [vmem:[%s3192_s2 + $0x60] sm:$0xff] }
  0x12   : > { %450 = vmatpush.msrb.mxu2 %v2626_v17  ;;  %356 = vmatpush.msra.mxu3 %v2616_v15  ;;  %v2647_v20 = vld [vmem:[%s3192_s2 + $0x78] sm:$0xff]  ;;  %v2652_v21 = vld [vmem:[%s3192_s2 + $0x70] sm:$0xff]  ;;  %v2671_v24 = vld [vmem:[%s3192_s2 + $0x88] sm:$0xff] }
  0x13   : > { %405 = vmatpush.msrb.mxu0 %v2635_v18  ;;  %v2657_v22 = vld [vmem:[%s3192_s2 + $0x58] sm:$0xff]  ;;  %v2664_v23 = vld [vmem:[%s3192_s2 + $0x50] sm:$0xff]  ;;  %v2676_v25 = vld [vmem:[%s3192_s2 + $0xa8] sm:$0xff] }
  0x14   : > { %451 = vmatpush.msrb.mxu2 %v2640_v19  ;;  %473 = vmatpush.msrb.mxu3 %v2647_v20  ;;  %v2681_v28 = vld [vmem:[%s3192_s2 + $0xa0] sm:$0xff]  ;;  %v2390_v31 = vld [vmem:[%s2569_s29 + $0x38] sm:$0x7f]  ;;  %v2389_v32 = vld [vmem:[%s2569_s29 + $0x30] sm:$0x7f] }
  0x15   : > { %427 = vmatpush.msrb.mxu1 %v2657_v22  ;;  %v2688_v29 = vld [vmem:[%s3192_s2 + $0x80] sm:$0xff]  ;;  %v2711_v37 = vld [vmem:[%s3192_s2 + $0xb8] sm:$0xff]  ;;  %v2723_v39 = vld [vmem:[%s3192_s2 + $0xc8] sm:$0xff] }
  0x16   : > { %474 = vmatpush.msrb.mxu3 %v2652_v21  ;;  %v2387_v30 = vld [vmem:[%s2569_s29 + $0x20] sm:$0x7f]  ;;  %v2716_v38 = vld [vmem:[%s3192_s2 + $0x98] sm:$0xff]  ;;  %v2728_v40 = vld [vmem:[%s3192_s2 + $0xe8] sm:$0xff] }
  0x17   : > { %337 = vrot.lane.b32.xlu0 %v247_v7, %s2503_s30  ;;  %428 = vmatpush.msrb.mxu1 %v2664_v23  ;;  %v231_v33 = vld [vmem:[%s2696_s18] sm:$0xff]  ;;  %v2736_v41 = vld [vmem:[%s3192_s2 + $0xb0] sm:$0xff]  ;;  %v2388_v47 = vld [vmem:[%s2569_s29 + $0x28] sm:$0x7f] }
  0x18   : > { %287 = vrot.lane.b32.xlu1 %v245_v8, %s2503_s30  ;;  %580 = vrot.lane.b32.xlu2 %v2583_v9, %s2503_s30  ;;  %v235_v34 = vsub.f32 0.0, %v231_v33  ;;  %v2741_v42 = vld [vmem:[%s3192_s2 + $0x90] sm:$0xff]  ;;  %v2748_v43 = vld [vmem:[%s3192_s2 + $0xc0] sm:$0xff] }
  0x19   : > { %v2753_v44 = vld [vmem:[%s3192_s2 + $0xe0] sm:$0xff]  ;;  %v2758_v46 = vld [vmem:[%s2569_s29 + $0x30] sm:$0xff]  ;;  %v2764_v48 = vld [vmem:[%s2569_s29 + $0x38] sm:$0xff] }
  0x1a   : > { %240 = vst.msk [vmem:[#allocation2] sm:$0xff] %vm239_vm1, %v235_v34  ;;  %v2774_v50 = vld [vmem:[%s3192_s2 + $0xf8] sm:$0xff]  ;;  %v2792_v52 = vld [vmem:[%s3192_s2 + $0xf0] sm:$0xff]  ;;  %v2802_v54 = vld [vmem:[%s2569_s29 + $0x28] sm:$0xff] }
  0x1b   : > { %v2779_v51 = vld [vmem:[%s3192_s2 + $0xd8] sm:$0xff]  ;;  %v2797_v53 = vld [vmem:[%s3192_s2 + $0xd0] sm:$0xff]  ;;  %v612_v57 = vld [vmem:[%s2569_s29 + $0x1] sm:$0x7f] }
  0x1c   : > { %v614_v58 = vld [vmem:[%s2569_s29 + $0x11] sm:$0x7f]  ;;  %v613_v59 = vld [vmem:[%s2569_s29 + $0x9] sm:$0x7f]  ;;  %v615_v60 = vld [vmem:[%s2569_s29 + $0x19] sm:$0x7f] }
  0x1d   : > { %v233_v61 = vld [vmem:[%s2696_s18 + $0x10] sm:$0xff]  ;;  %v232_v63 = vld [vmem:[%s2696_s18 + $0x8] sm:$0xff]  ;;  %v2822_v5 = vld [vmem:[%s2569_s29 + $0x20] sm:$0xff] }
  0x1e   : > { %v237_v62 = vsub.f32 0.0, %v233_v61  ;;  %v236_v4 = vsub.f32 0.0, %v232_v63  ;;  %v2867_v63 = vld [vmem:[%s3193_s3 + $0x30] sm:$0xff] }
  0x1f   : > { %505 = vrot.lane.b32.xlu0 %v487_v10, %s2503_s30 }
  0x20   : > { %530 = vrot.lane.b32.xlu1 %v2591_v11, %s2503_s30  ;;  %1317 = vrot.lane.b32.xlu2 %v2389_v32, %s2503_s30  ;;  %242 = vst.msk [vmem:[#allocation2 + $0x10] sm:$0xff] %vm239_vm1, %v237_v62 }
  0x21   : > { %241 = vst.msk [vmem:[#allocation2 + $0x8] sm:$0xff] %vm239_vm1, %v236_v4  ;;  %v248_v8 = vld [vmem:[#allocation2 + $0x1] sm:$0x7f] }
  0x27   : > { %1342 = vrot.lane.b32.xlu0 %v2390_v31, %s2503_s30  ;;  %v2833_v31 = vld [vmem:[%s3193_s3] sm:$0xff] }
  0x28   : > { %1267 = vrot.lane.b32.xlu1 %v2387_v30, %s2503_s30  ;;  %1292 = vrot.lane.b32.xlu2 %v2388_v47, %s2503_s30  ;;  %v2842_v47 = vld [vmem:[%s3193_s3 + $0x10] sm:$0xff] }
  0x2f   : > { %1557 = vrot.lane.b32.xlu0 %v2758_v46, %s2503_s30 }
  0x30   : > { %1582 = vrot.lane.b32.xlu1 %v2764_v48, %s2503_s30  ;;  %1507 = vrot.lane.b32.xlu2 %v2822_v5, %s2503_s30 }
  0x37   : > { %1532 = vrot.lane.b32.xlu0 %v2802_v54, %s2503_s30 }
  0x6a   : > { %v556_v45 = vpop.permute.xlu2 %555 }
  0x72   : > { %v581_v55 = vpop.permute.xlu2 %580 }
  0x81   : > { %v313_v26 = vpop.permute.xlu0 %312 }
  0x82   : > { %v262_v27 = vpop.permute.xlu1 %261  ;;  %2317 = vmatmul.msk.f32.vlgmr.msra.gmra.mxu2 %vm263_vm0, %v313_v26 }
  0x83   : > { %2315 = vmatmul.msk.f32.vlgmr.msra.gmra.mxu0 %vm263_vm0, %v262_v27  ;;  %573 = vmatpush.msra.mxu2 %v2676_v25  ;;  %v249_v27 = vld [vmem:[#allocation2 + $0x9] sm:$0x7f] }
  0x84   : > { %523 = vmatpush.msra.mxu0 %v2671_v24 }
  0x85   : > { %574 = vmatpush.msra.mxu2 %v2681_v28 }
  0x86   : > { %524 = vmatpush.msra.mxu0 %v2688_v29 }
  0x89   : > { %v338_v35 = vpop.permute.xlu0 %337 }
  0x8a   : > { %v288_v36 = vpop.permute.xlu1 %287  ;;  %2318 = vmatmul.msk.f32.vlgmr.msra.gmra.mxu3 %vm263_vm0, %v338_v35  ;;  %2329 = vmatmul.msk.f32.vlgmr.msrb.gmra.mxu2 %vm263_vm0, %v2576_v6  ;;  %v234_v6 = vld [vmem:[%s2696_s18 + $0x18] sm:$0xff] }
  0x8b   : > { %2316 = vmatmul.msk.f32.vlgmr.msra.gmra.mxu1 %vm263_vm0, %v288_v36  ;;  %2327 = vmatmul.msk.f32.vlgmr.msrb.gmra.mxu0 %vm263_vm0, %v487_v10  ;;  %v238_v7 = vsub.f32 0.0, %v234_v6 }
  0x8c   : > { %598 = vmatpush.msra.mxu3 %v2711_v37  ;;  %548 = vmatpush.msra.mxu1 %v2716_v38 }
  0x8d   : > { %646 = vmatpush.msrb.mxu0 %v2723_v39  ;;  %692 = vmatpush.msrb.mxu2 %v2728_v40  ;;  %243 = vst.msk [vmem:[#allocation2 + $0x18] sm:$0xff] %vm239_vm1, %v238_v7 }
  0x8e   : > { %599 = vmatpush.msra.mxu3 %v2736_v41  ;;  %549 = vmatpush.msra.mxu1 %v2741_v42 }
  0x8f   : > { %647 = vmatpush.msrb.mxu0 %v2748_v43  ;;  %693 = vmatpush.msrb.mxu2 %v2753_v44 }
  0x91   : > { %v506_v49 = vpop.permute.xlu0 %505 }
  0x92   : > { %2330 = vmatmul.msk.f32.vlgmr.msrb.gmra.mxu3 %vm263_vm0, %v2583_v9  ;;  %2341 = vmatmul.msk.f32.vlgmr.msra.gmra.mxu2 %vm263_vm0, %v556_v45  ;;  %v531_v56 = vpop.permute.xlu1 %530 }
  0x93   : > { %2328 = vmatmul.msk.f32.vlgmr.msrb.gmra.mxu1 %vm263_vm0, %v2591_v11  ;;  %2339 = vmatmul.msk.f32.vlgmr.msra.gmra.mxu0 %vm263_vm0, %v506_v49  ;;  %v250_v11 = vld [vmem:[#allocation2 + $0x11] sm:$0x7f] }
  0x94   : > { %715 = vmatpush.msrb.mxu3 %v2774_v50  ;;  %669 = vmatpush.msrb.mxu1 %v2779_v51  ;;  %v251_v45 = vld [vmem:[#allocation2 + $0x19] sm:$0x7f] }
  0x95   : > { %760 = vmatpush.msra.mxu0 %v2833_v31  ;;  %806 = vmatpush.msra.mxu2 %v2842_v47 }
  0x96   : > { %716 = vmatpush.msrb.mxu3 %v2792_v52  ;;  %670 = vmatpush.msrb.mxu1 %v2797_v53 }
  0x9a   : > { %2342 = vmatmul.msk.f32.vlgmr.msra.gmra.mxu3 %vm263_vm0, %v581_v55  ;;  %2353 = vmatmul.msk.f32.vlgmr.msrb.gmra.mxu2 %vm263_vm0, %v614_v58  ;;  %v2853_v58 = vld [vmem:[%s3193_s3 + $0x8] sm:$0xff] }
  0x9b   : > { %2340 = vmatmul.msk.f32.vlgmr.msra.gmra.mxu1 %vm263_vm0, %v531_v56  ;;  %2351 = vmatmul.msk.f32.vlgmr.msrb.gmra.mxu0 %vm263_vm0, %v612_v57  ;;  %v2848_v57 = vld [vmem:[%s3193_s3 + $0x18] sm:$0xff] }
  0x9c   : > { %829 = vmatpush.msra.mxu3 %v2848_v57  ;;  %783 = vmatpush.msra.mxu1 %v2853_v58 }
  0x9d   : > { %936 = vmatpush.msrb.mxu2 %v2867_v63 }
  0xa2   : > { %2354 = vmatmul.msk.f32.vlgmr.msrb.gmra.mxu3 %vm263_vm0, %v615_v60 }
  0xa3   : > { %2352 = vmatmul.msk.f32.vlgmr.msrb.gmra.mxu1 %vm263_vm0, %v613_v59  ;;  %v2858_v59 = vld [vmem:[%s3193_s3 + $0x20] sm:$0xff] }
  0xa4   : > { %890 = vmatpush.msrb.mxu0 %v2858_v59 }
 0x100   : > { %v283_v9 = vpop.f32.mrf.mxu0 }
 0x101   : > { %v361_v10 = vadd.f32 %v283_v9, %v248_v8 }
 0x103   : > { %366 = vst.msk [vmem:[#allocation2 + $0x1] sm:$0x7f] %vm365_vm2, %v361_v10 }
 0x105   : > { %v333_v26 = vpop.f32.mrf.mxu2 }
 0x106   : > { %v363_v30 = vadd.f32 %v333_v26, %v250_v11  ;;  %v2876_v11 = vld [vmem:[%s3193_s3 + $0x38] sm:$0xff]  ;;  %v2881_v26 = vld [vmem:[%s3193_s3 + $0x28] sm:$0xff] }
 0x107   : > { %959 = vmatpush.msrb.mxu3 %v2876_v11  ;;  %913 = vmatpush.msrb.mxu1 %v2881_v26 }
 0x108   : > { %v308_v32 = vpop.f32.mrf.mxu1  ;;  %368 = vst.msk [vmem:[#allocation2 + $0x11] sm:$0x7f] %vm365_vm2, %v363_v30  ;;  %v407_v34 = vpop.f32.mrf.mxu0 }
 0x109   : > { %v362_v33 = vadd.f32 %v308_v32, %v249_v27 }
 0x10a   : > { %v374_v35 = vld [vmem:[#allocation2] sm:$0xff] }
 0x10b   : > { %367 = vst.msk [vmem:[#allocation2 + $0x9] sm:$0x7f] %vm365_vm2, %v362_v33  ;;  %v479_v36 = vadd.f32 %v407_v34, %v374_v35 }
 0x10d   : > { %483 = vst.msk [vmem:[#allocation2] sm:$0xff] %vm239_vm1, %v479_v36  ;;  %v358_v49 = vpop.f32.mrf.mxu3  ;;  %v453_v56 = vpop.f32.mrf.mxu2 }
 0x10e   : > { %v364_v55 = vadd.f32 %v358_v49, %v251_v45 }
 0x10f   : > { %v376_v60 = vld [vmem:[#allocation2 + $0x10] sm:$0xff] }
 0x110   : > { %v430_v61 = vpop.f32.mrf.mxu1  ;;  %369 = vst.msk [vmem:[#allocation2 + $0x19] sm:$0x7f] %vm365_vm2, %v364_v55  ;;  %v481_v62 = vadd.f32 %v453_v56, %v376_v60  ;;  %v526_v6 = vpop.f32.mrf.mxu0 }
 0x112   : > { %v375_v4 = vld [vmem:[#allocation2 + $0x8] sm:$0xff]  ;;  %485 = vst.msk [vmem:[#allocation2 + $0x10] sm:$0xff] %vm239_vm1, %v481_v62 }
 0x113   : > { %v480_v7 = vadd.f32 %v430_v61, %v375_v4 }
 0x114   : > { %v491_v8 = vld [vmem:[#allocation2] sm:$0xff] }
 0x115   : > { %484 = vst.msk [vmem:[#allocation2 + $0x8] sm:$0xff] %vm239_vm1, %v480_v7  ;;  %v604_v9 = vadd.f32 %v526_v6, %v491_v8  ;;  %v476_v10 = vpop.f32.mrf.mxu3  ;;  %v576_v30 = vpop.f32.mrf.mxu2 }
 0x117   : > { %608 = vst.msk [vmem:[#allocation2] sm:$0xff] %vm239_vm1, %v604_v9  ;;  %v377_v27 = vld [vmem:[#allocation2 + $0x18] sm:$0xff] }
 0x118   : > { %v482_v32 = vadd.f32 %v476_v10, %v377_v27  ;;  %v551_v34 = vpop.f32.mrf.mxu1  ;;  %v649_v45 = vpop.f32.mrf.mxu0  ;;  %v2894_v27 = vld [vmem:[%s3193_s3 + $0x40] sm:$0xff] }
 0x119   : > { %v493_v33 = vld [vmem:[#allocation2 + $0x10] sm:$0xff] }
 0x11a   : > { %486 = vst.msk [vmem:[#allocation2 + $0x18] sm:$0xff] %vm239_vm1, %v482_v32  ;;  %v606_v35 = vadd.f32 %v576_v30, %v493_v33 }
 0x11c   : > { %v492_v36 = vld [vmem:[#allocation2 + $0x8] sm:$0xff]  ;;  %610 = vst.msk [vmem:[#allocation2 + $0x10] sm:$0xff] %vm239_vm1, %v606_v35  ;;  %v2902_v35 = vld [vmem:[%s3193_s3 + $0x50] sm:$0xff] }
 0x11d   : > { %v605_v49 = vadd.f32 %v551_v34, %v492_v36  ;;  %v601_v60 = vpop.f32.mrf.mxu3  ;;  %v695_v62 = vpop.f32.mrf.mxu2 }
 0x11e   : > { %v616_v55 = vld [vmem:[#allocation2] sm:$0x7f] }
 0x11f   : > { %609 = vst.msk [vmem:[#allocation2 + $0x8] sm:$0xff] %vm239_vm1, %v605_v49  ;;  %v721_v56 = vadd.f32 %v649_v45, %v616_v55  ;;  %v2909_v49 = vld [vmem:[%s3193_s3 + $0x48] sm:$0xff]  ;;  %v2914_v55 = vld [vmem:[%s3193_s3 + $0x60] sm:$0xff] }
 0x120   : > { %v672_v7 = vpop.f32.mrf.mxu1 }
 0x121   : > { %725 = vst.msk [vmem:[#allocation2] sm:$0x7f] %vm365_vm2, %v721_v56  ;;  %v494_v61 = vld [vmem:[#allocation2 + $0x18] sm:$0xff] }
 0x122   : > { %v607_v4 = vadd.f32 %v601_v60, %v494_v61  ;;  %v2924_v60 = vld [vmem:[%s3193_s3 + $0x58] sm:$0xff]  ;;  %v2929_v61 = vld [vmem:[%s3193_s3 + $0x70] sm:$0xff] }
 0x123   : > { %v618_v6 = vld [vmem:[#allocation2 + $0x10] sm:$0x7f] }
 0x124   : > { %611 = vst.msk [vmem:[#allocation2 + $0x18] sm:$0xff] %vm239_vm1, %v607_v4  ;;  %v723_v8 = vadd.f32 %v695_v62, %v618_v6 }
 0x125   : > { %v718_v32 = vpop.f32.mrf.mxu3 }
 0x126   : > { %v617_v9 = vld [vmem:[#allocation2 + $0x8] sm:$0x7f]  ;;  %727 = vst.msk [vmem:[#allocation2 + $0x10] sm:$0x7f] %vm365_vm2, %v723_v8  ;;  %v2948_v8 = vld [vmem:[%s3193_s3 + $0x78] sm:$0xff] }
 0x127   : > { %v722_v10 = vadd.f32 %v672_v7, %v617_v9  ;;  %v2936_v7 = vld [vmem:[%s3193_s3 + $0x68] sm:$0xff] }
 0x128   : > { %v734_v30 = vld [vmem:[#allocation2 + $0x1] sm:$0x7f] }
 0x129   : > { %726 = vst.msk [vmem:[#allocation2 + $0x8] sm:$0x7f] %vm365_vm2, %v722_v10  ;;  %2355 = vmatmul.msk.f32.vlgmr.msra.gmra.mxu0 %vm239_vm1, %v734_v30  ;;  %v863_v45 = vld [vmem:[#allocation2] sm:$0xff]  ;;  %v1268_v30 = vpop.permute.xlu1 %1267 }
 0x12a   : > { %1003 = vmatpush.msra.mxu0 %v2894_v27  ;;  %v1106_v10 = vld [vmem:[#allocation2] sm:$0x7f] }
 0x12b   : > { %v619_v33 = vld [vmem:[#allocation2 + $0x18] sm:$0x7f] }
 0x12c   : > { %v724_v34 = vadd.f32 %v718_v32, %v619_v33 }
 0x12d   : > { %v736_v36 = vld [vmem:[#allocation2 + $0x11] sm:$0x7f] }
 0x12e   : > { %728 = vst.msk [vmem:[#allocation2 + $0x18] sm:$0x7f] %vm365_vm2, %v724_v34  ;;  %2357 = vmatmul.msk.f32.vlgmr.msra.gmra.mxu2 %vm239_vm1, %v736_v36  ;;  %v865_v4 = vld [vmem:[#allocation2 + $0x10] sm:$0xff] }
 0x12f   : > { %1049 = vmatpush.msra.mxu2 %v2902_v35 }
 0x130   : > { %v735_v56 = vld [vmem:[#allocation2 + $0x9] sm:$0x7f] }
 0x131   : > { %2356 = vmatmul.msk.f32.vlgmr.msra.gmra.mxu1 %vm239_vm1, %v735_v56  ;;  %2363 = vmatmul.msk.f32.vlgmr.msrb.gmra.mxu0 %vm239_vm1, %v863_v45  ;;  %v864_v6 = vld [vmem:[#allocation2 + $0x8] sm:$0xff] }
 0x132   : > { %1026 = vmatpush.msra.mxu1 %v2909_v49  ;;  %1133 = vmatpush.msrb.mxu0 %v2914_v55 }
 0x135   : > { %v737_v62 = vld [vmem:[#allocation2 + $0x19] sm:$0x7f] }
 0x136   : > { %2358 = vmatmul.msk.f32.vlgmr.msra.gmra.mxu3 %vm239_vm1, %v737_v62  ;;  %2365 = vmatmul.msk.f32.vlgmr.msrb.gmra.mxu2 %vm239_vm1, %v865_v4  ;;  %v866_v9 = vld [vmem:[#allocation2 + $0x18] sm:$0xff] }
 0x137   : > { %1072 = vmatpush.msra.mxu3 %v2924_v60  ;;  %1179 = vmatpush.msrb.mxu2 %v2929_v61 }
 0x139   : > { %2364 = vmatmul.msk.f32.vlgmr.msrb.gmra.mxu1 %vm239_vm1, %v864_v6  ;;  %2371 = vmatmul.msk.f32.vlgmr.msra.gmra.mxu0 %vm239_vm1, %v863_v45 }
 0x13a   : > { %1285 = vmatpush.msra.mxu0 %v2542_v0  ;;  %1156 = vmatpush.msrb.mxu1 %v2936_v7  ;;  %v1318_v0 = vpop.permute.xlu2 %1317 }
 0x13c   : > { %1286 = vmatpush.msra.mxu0 %v2552_v2  ;;  %v1108_v2 = vld [vmem:[#allocation2 + $0x10] sm:$0x7f] }
 0x13e   : > { %2366 = vmatmul.msk.f32.vlgmr.msrb.gmra.mxu3 %vm239_vm1, %v866_v9  ;;  %2373 = vmatmul.msk.f32.vlgmr.msra.gmra.mxu2 %vm239_vm1, %v865_v4 }
 0x13f   : > { %1202 = vmatpush.msrb.mxu3 %v2948_v8  ;;  %1335 = vmatpush.msra.mxu2 %v2547_v1  ;;  %v1107_v1 = vld [vmem:[#allocation2 + $0x8] sm:$0x7f] }
 0x141   : > { %2372 = vmatmul.msk.f32.vlgmr.msra.gmra.mxu1 %vm239_vm1, %v864_v6  ;;  %2379 = vmatmul.msk.f32.vlgmr.msrb.gmra.mxu0 %vm239_vm1, %v1106_v10 }
 0x142   : > { %1310 = vmatpush.msra.mxu1 %v2599_v12  ;;  %1336 = vmatpush.msra.mxu2 %v2559_v3  ;;  %v1343_v3 = vpop.permute.xlu0 %1342  ;;  %v1109_v12 = vld [vmem:[#allocation2 + $0x18] sm:$0x7f] }
 0x143   : > { %1407 = vmatpush.msrb.mxu0 %v2621_v16 }
 0x144   : > { %1311 = vmatpush.msra.mxu1 %v2609_v14 }
 0x145   : > { %1408 = vmatpush.msrb.mxu0 %v2635_v18  ;;  %v1583_v18 = vpop.permute.xlu1 %1582 }
 0x146   : > { %2374 = vmatmul.msk.f32.vlgmr.msra.gmra.mxu3 %vm239_vm1, %v866_v9  ;;  %2381 = vmatmul.msk.f32.vlgmr.msrb.gmra.mxu2 %vm239_vm1, %v1108_v2 }
 0x147   : > { %1360 = vmatpush.msra.mxu3 %v2604_v13  ;;  %1453 = vmatpush.msrb.mxu2 %v2626_v17  ;;  %v1293_v13 = vpop.permute.xlu2 %1292  ;;  %v2427_v17 = vld [vmem:[%s2569_s29 + $0x21] sm:$0x7f] }
 0x149   : > { %2380 = vmatmul.msk.f32.vlgmr.msrb.gmra.mxu1 %vm239_vm1, %v1107_v1  ;;  %2391 = vmatmul.msk.f32.vlgmr.msra.gmra.mxu0 %vm263_vm0, %v1268_v30 }
 0x14a   : > { %1361 = vmatpush.msra.mxu3 %v2616_v15  ;;  %1430 = vmatpush.msrb.mxu1 %v2657_v22  ;;  %v1558_v14 = vpop.permute.xlu0 %1557  ;;  %v2383_v22 = vld [vmem:[%s2696_s18 + $0x20] sm:$0xff] }
 0x14b   : > { %1454 = vmatpush.msrb.mxu2 %v2640_v19  ;;  %1525 = vmatpush.msra.mxu0 %v2671_v24  ;;  %v2429_v19 = vld [vmem:[%s2569_s29 + $0x31] sm:$0x7f]  ;;  %v2384_v24 = vld [vmem:[%s2696_s18 + $0x28] sm:$0xff] }
 0x14c   : > { %1431 = vmatpush.msrb.mxu1 %v2664_v23  ;;  %v1241_v23 = vsub.f32 0.0, %v2383_v22 }
 0x14d   : > { %1526 = vmatpush.msra.mxu0 %v2688_v29  ;;  %v2385_v29 = vld [vmem:[%s2696_s18 + $0x30] sm:$0xff] }
 0x14e   : > { %2382 = vmatmul.msk.f32.vlgmr.msrb.gmra.mxu3 %vm239_vm1, %v1109_v12  ;;  %2393 = vmatmul.msk.f32.vlgmr.msra.gmra.mxu2 %vm263_vm0, %v1318_v0  ;;  %1245 = vst.msk [vmem:[#allocation2] sm:$0xff] %vm239_vm1, %v1241_v23 }
 0x14f   : > { %1476 = vmatpush.msrb.mxu3 %v2647_v20  ;;  %1575 = vmatpush.msra.mxu2 %v2676_v25  ;;  %v1508_v15 = vpop.permute.xlu2 %1507  ;;  %v2428_v20 = vld [vmem:[%s2569_s29 + $0x29] sm:$0x7f]  ;;  %v1242_v25 = vsub.f32 0.0, %v2384_v24 }
 0x151   : > { %2392 = vmatmul.msk.f32.vlgmr.msra.gmra.mxu1 %vm263_vm0, %v1293_v13  ;;  %2407 = vmatmul.msk.f32.vlgmr.msrb.gmra.mxu0 %vm263_vm0, %v2822_v5  ;;  %1246 = vst.msk [vmem:[#allocation2 + $0x8] sm:$0xff] %vm239_vm1, %v1242_v25 }
 0x152   : > { %1477 = vmatpush.msrb.mxu3 %v2652_v21  ;;  %1550 = vmatpush.msra.mxu1 %v2716_v38  ;;  %v1533_v16 = vpop.permute.xlu0 %1532  ;;  %v2430_v21 = vld [vmem:[%s2569_s29 + $0x39] sm:$0x7f] }
 0x153   : > { %1576 = vmatpush.msra.mxu2 %v2681_v28  ;;  %1647 = vmatpush.msrb.mxu0 %v2723_v39 }
 0x154   : > { %1551 = vmatpush.msra.mxu1 %v2741_v42 }
 0x155   : > { %1648 = vmatpush.msrb.mxu0 %v2748_v43 }
 0x156   : > { %2394 = vmatmul.msk.f32.vlgmr.msra.gmra.mxu3 %vm263_vm0, %v1343_v3  ;;  %2409 = vmatmul.msk.f32.vlgmr.msrb.gmra.mxu2 %vm263_vm0, %v2758_v46 }
 0x157   : > { %1600 = vmatpush.msra.mxu3 %v2711_v37  ;;  %1693 = vmatpush.msrb.mxu2 %v2728_v40  ;;  %v1243_v37 = vsub.f32 0.0, %v2385_v29  ;;  %v2386_v40 = vld [vmem:[%s2696_s18 + $0x38] sm:$0xff] }
 0x159   : > { %2408 = vmatmul.msk.f32.vlgmr.msrb.gmra.mxu1 %vm263_vm0, %v2802_v54  ;;  %2423 = vmatmul.msk.f32.vlgmr.msra.gmra.mxu0 %vm263_vm0, %v1508_v15  ;;  %1247 = vst.msk [vmem:[#allocation2 + $0x10] sm:$0xff] %vm239_vm1, %v1243_v37  ;;  %v1254_v54 = vld [vmem:[#allocation2 + $0x1] sm:$0x7f] }
 0x15a   : > { %1601 = vmatpush.msra.mxu3 %v2736_v41  ;;  %1670 = vmatpush.msrb.mxu1 %v2779_v51  ;;  %v1244_v41 = vsub.f32 0.0, %v2386_v40 }
 0x15b   : > { %1694 = vmatpush.msrb.mxu2 %v2753_v44  ;;  %1760 = vmatpush.msra.mxu0 %v2833_v31 }
 0x15c   : > { %1671 = vmatpush.msrb.mxu1 %v2797_v53  ;;  %1248 = vst.msk [vmem:[#allocation2 + $0x18] sm:$0xff] %vm239_vm1, %v1244_v41 }
 0x15e   : > { %2410 = vmatmul.msk.f32.vlgmr.msrb.gmra.mxu3 %vm263_vm0, %v2764_v48  ;;  %2425 = vmatmul.msk.f32.vlgmr.msra.gmra.mxu2 %vm263_vm0, %v1558_v14 }
 0x15f   : > { %1716 = vmatpush.msrb.mxu3 %v2774_v50  ;;  %1806 = vmatpush.msra.mxu2 %v2842_v47 }
 0x160   : > { %v1256_v33 = vld [vmem:[#allocation2 + $0x11] sm:$0x7f] }
 0x161   : > { %2424 = vmatmul.msk.f32.vlgmr.msra.gmra.mxu1 %vm263_vm0, %v1533_v16  ;;  %2439 = vmatmul.msk.f32.vlgmr.msrb.gmra.mxu0 %vm263_vm0, %v2427_v17 }
 0x162   : > { %1717 = vmatpush.msrb.mxu3 %v2792_v52  ;;  %1783 = vmatpush.msra.mxu1 %v2853_v58 }
 0x163   : > { %1888 = vmatpush.msrb.mxu0 %v2858_v59  ;;  %v1255_v59 = vld [vmem:[#allocation2 + $0x9] sm:$0x7f]  ;;  %v1257_v6 = vld [vmem:[#allocation2 + $0x19] sm:$0x7f] }
 0x166   : > { %2426 = vmatmul.msk.f32.vlgmr.msra.gmra.mxu3 %vm263_vm0, %v1583_v18  ;;  %2441 = vmatmul.msk.f32.vlgmr.msrb.gmra.mxu2 %vm263_vm0, %v2429_v19  ;;  %v2505_v19 = vmov 0.0  }
 0x167   : > { %1829 = vmatpush.msra.mxu3 %v2848_v57  ;;  %1934 = vmatpush.msrb.mxu2 %v2867_v63  ;;  %731 = vst.msk [vmem:[#allocation3 + $0x8] sm:$0xff] %vm729_vm3, %v2505_v19 }
 0x168   : > { %730 = vst.msk [vmem:[#allocation3] sm:$0xff] %vm729_vm3, %v2505_v19 }
 0x169   : > { %2440 = vmatmul.msk.f32.vlgmr.msrb.gmra.mxu1 %vm263_vm0, %v2428_v20  ;;  %732 = vst.msk [vmem:[#allocation3 + $0x10] sm:$0xff] %vm729_vm3, %v2505_v19 }
 0x16a   : > { %1911 = vmatpush.msrb.mxu1 %v2881_v26  ;;  %733 = vst.msk [vmem:[#allocation3 + $0x18] sm:$0xff] %vm729_vm3, %v2505_v19 }
 0x16e   : > { %2442 = vmatmul.msk.f32.vlgmr.msrb.gmra.mxu3 %vm263_vm0, %v2430_v21 }
 0x16f   : > { %1957 = vmatpush.msrb.mxu3 %v2876_v11 }
 0x1a6   : > { %v762_v28 = vpop.f32.mrf.mxu0 }
 0x1a7   : > { %842 = vrot.lane.b32.xlu1 %v762_v28, %s2504_s8 }
 0x1ae   : > { %v785_v38 = vpop.f32.mrf.mxu1  ;;  %v3028_v39 = vpop.f32.mrf.mxu0 }
 0x1af   : > { %844 = vrot.lane.b32.xlu2 %v785_v38, %s2504_s8 }
 0x1b1   : > { %v808_v42 = vpop.f32.mrf.mxu2 }
 0x1b2   : > { %846 = vrot.lane.b32.xlu0 %v808_v42, %s2504_s8 }
 0x1b6   : > { %v3034_v43 = vpop.f32.mrf.mxu1  ;;  %v1005_v44 = vpop.f32.mrf.mxu0 }
 0x1b7   : > { %1085 = vrot.lane.b32.xlu2 %v1005_v44, %s2504_s8 }
 0x1b9   : > { %v831_v46 = vpop.f32.mrf.mxu3  ;;  %v3037_v48 = vpop.f32.mrf.mxu2 }
 0x1ba   : > { %848 = vrot.lane.b32.xlu1 %v831_v46, %s2504_s8 }
 0x1be   : > { %v1028_v50 = vpop.f32.mrf.mxu1  ;;  %v3040_v51 = vpop.f32.mrf.mxu0 }
 0x1bf   : > { %1087 = vrot.lane.b32.xlu0 %v1028_v50, %s2504_s8 }
 0x1c1   : > { %v3043_v52 = vpop.f32.mrf.mxu3  ;;  %v1051_v53 = vpop.f32.mrf.mxu2 }
 0x1c2   : > { %1089 = vrot.lane.b32.xlu1 %v1051_v53, %s2504_s8 }
 0x1c6   : > { %v3046_v5 = vpop.f32.mrf.mxu1  ;;  %v1288_v31 = vpop.f32.mrf.mxu0 }
 0x1c7   : > { %v1366_v47 = vadd.f32 %v1288_v31, %v1254_v54 }
 0x1c9   : > { %1370 = vst.msk [vmem:[#allocation2 + $0x1] sm:$0x7f] %vm365_vm2, %v1366_v47  ;;  %v1074_v57 = vpop.f32.mrf.mxu3  ;;  %v3049_v58 = vpop.f32.mrf.mxu2 }
 0x1ca   : > { %1091 = vrot.lane.b32.xlu2 %v1074_v57, %s2504_s8 }
 0x1ce   : > { %v1313_v63 = vpop.f32.mrf.mxu1  ;;  %v1410_v11 = vpop.f32.mrf.mxu0 }
 0x1cf   : > { %v1367_v26 = vadd.f32 %v1313_v63, %v1255_v59 }
 0x1d0   : > { %v1378_v32 = vld [vmem:[#allocation2] sm:$0xff] }
 0x1d1   : > { %1371 = vst.msk [vmem:[#allocation2 + $0x9] sm:$0x7f] %vm365_vm2, %v1367_v26  ;;  %v1482_v34 = vadd.f32 %v1410_v11, %v1378_v32  ;;  %v3053_v36 = vpop.f32.mrf.mxu3  ;;  %v1338_v45 = vpop.f32.mrf.mxu2 }
 0x1d2   : > { %v1368_v56 = vadd.f32 %v1338_v45, %v1256_v33  ;;  %v834_v45 = vld [vmem:[#allocation3] sm:$0x7f] }
 0x1d3   : > { %1486 = vst.msk [vmem:[#allocation2] sm:$0xff] %vm239_vm1, %v1482_v34 }
 0x1d4   : > { %1372 = vst.msk [vmem:[#allocation2 + $0x11] sm:$0x7f] %vm365_vm2, %v1368_v56 }
 0x1d6   : > { %v1433_v62 = vpop.f32.mrf.mxu1  ;;  %v1528_v9 = vpop.f32.mrf.mxu0 }
 0x1d8   : > { %v1379_v4 = vld [vmem:[#allocation2 + $0x8] sm:$0xff] }
 0x1d9   : > { %v1483_v10 = vadd.f32 %v1433_v62, %v1379_v4  ;;  %v1363_v0 = vpop.f32.mrf.mxu3  ;;  %v1456_v30 = vpop.f32.mrf.mxu2 }
 0x1da   : > { %v1494_v2 = vld [vmem:[#allocation2] sm:$0xff]  ;;  %v1369_v1 = vadd.f32 %v1363_v0, %v1257_v6  ;;  %v836_v6 = vld [vmem:[#allocation3 + $0x10] sm:$0x7f] }
 0x1db   : > { %1487 = vst.msk [vmem:[#allocation2 + $0x8] sm:$0xff] %vm239_vm1, %v1483_v10  ;;  %v1606_v3 = vadd.f32 %v1528_v9, %v1494_v2  ;;  %v1380_v12 = vld [vmem:[#allocation2 + $0x10] sm:$0xff] }
 0x1dc   : > { %1373 = vst.msk [vmem:[#allocation2 + $0x19] sm:$0x7f] %vm365_vm2, %v1369_v1  ;;  %v1484_v13 = vadd.f32 %v1456_v30, %v1380_v12 }
 0x1dd   : > { %1610 = vst.msk [vmem:[#allocation2] sm:$0xff] %vm239_vm1, %v1606_v3 }
 0x1de   : > { %1488 = vst.msk [vmem:[#allocation2 + $0x10] sm:$0xff] %vm239_vm1, %v1484_v13  ;;  %v1553_v14 = vpop.f32.mrf.mxu1  ;;  %v1650_v18 = vpop.f32.mrf.mxu0 }
 0x1e1   : > { %v1479_v16 = vpop.f32.mrf.mxu3  ;;  %v1578_v21 = vpop.f32.mrf.mxu2 }
 0x1e2   : > { %v1495_v15 = vld [vmem:[#allocation2 + $0x8] sm:$0xff] }
 0x1e3   : > { %v1607_v17 = vadd.f32 %v1553_v14, %v1495_v15  ;;  %v1381_v20 = vld [vmem:[#allocation2 + $0x18] sm:$0xff] }
 0x1e4   : > { %v1485_v22 = vadd.f32 %v1479_v16, %v1381_v20  ;;  %v1618_v23 = vld [vmem:[#allocation2] sm:$0x7f] }
 0x1e5   : > { %1611 = vst.msk [vmem:[#allocation2 + $0x8] sm:$0xff] %vm239_vm1, %v1607_v17  ;;  %v1722_v24 = vadd.f32 %v1650_v18, %v1618_v23  ;;  %v1496_v25 = vld [vmem:[#allocation2 + $0x10] sm:$0xff] }
 0x1e6   : > { %1489 = vst.msk [vmem:[#allocation2 + $0x18] sm:$0xff] %vm239_vm1, %v1485_v22  ;;  %v1608_v28 = vadd.f32 %v1578_v21, %v1496_v25  ;;  %v1673_v29 = vpop.f32.mrf.mxu1 }
 0x1e7   : > { %1726 = vst.msk [vmem:[#allocation2] sm:$0x7f] %vm365_vm2, %v1722_v24 }
 0x1e8   : > { %1612 = vst.msk [vmem:[#allocation2 + $0x10] sm:$0xff] %vm239_vm1, %v1608_v28  ;;  %v1220_v28 = vld [vmem:[%s2569_s29] sm:$0xff] }
 0x1e9   : > { %v1603_v38 = vpop.f32.mrf.mxu3  ;;  %v1696_v42 = vpop.f32.mrf.mxu2 }
 0x1ec   : > { %v1619_v37 = vld [vmem:[#allocation2 + $0x8] sm:$0x7f] }
 0x1ed   : > { %v1723_v40 = vadd.f32 %v1673_v29, %v1619_v37  ;;  %v1497_v41 = vld [vmem:[#allocation2 + $0x18] sm:$0xff] }
 0x1ee   : > { %v1609_v44 = vadd.f32 %v1603_v38, %v1497_v41  ;;  %v1734_v46 = vld [vmem:[#allocation2 + $0x1] sm:$0x7f]  ;;  %v1221_v38 = vld [vmem:[%s2569_s29 + $0x8] sm:$0xff] }
 0x1ef   : > { %1727 = vst.msk [vmem:[#allocation2 + $0x8] sm:$0x7f] %vm365_vm2, %v1723_v40  ;;  %2443 = vmatmul.msk.f32.vlgmr.msra.gmra.mxu0 %vm239_vm1, %v1734_v46  ;;  %v1620_v50 = vld [vmem:[#allocation2 + $0x10] sm:$0x7f]  ;;  %v1862_v54 = vld [vmem:[#allocation2] sm:$0xff] }
 0x1f0   : > { %1613 = vst.msk [vmem:[#allocation2 + $0x18] sm:$0xff] %vm239_vm1, %v1609_v44  ;;  %v1724_v53 = vadd.f32 %v1696_v42, %v1620_v50  ;;  %2000 = vmatpush.msra.mxu0 %v2894_v27  ;;  %v1222_v50 = vld [vmem:[%s2569_s29 + $0x10] sm:$0xff] }
 0x1f1   : > { %v1719_v47 = vpop.f32.mrf.mxu3 }
 0x1f2   : > { %1728 = vst.msk [vmem:[#allocation2 + $0x10] sm:$0x7f] %vm365_vm2, %v1724_v53 }
 0x1f6   : > { %v1735_v31 = vld [vmem:[#allocation2 + $0x9] sm:$0x7f] }
 0x1f7   : > { %2444 = vmatmul.msk.f32.vlgmr.msra.gmra.mxu1 %vm239_vm1, %v1735_v31  ;;  %2451 = vmatmul.msk.f32.vlgmr.msrb.gmra.mxu0 %vm239_vm1, %v1862_v54  ;;  %v1621_v57 = vld [vmem:[#allocation2 + $0x18] sm:$0x7f]  ;;  %v1863_v27 = vld [vmem:[#allocation2 + $0x8] sm:$0xff] }
 0x1f8   : > { %2023 = vmatpush.msra.mxu1 %v2909_v49  ;;  %v1725_v59 = vadd.f32 %v1719_v47, %v1621_v57  ;;  %2128 = vmatpush.msrb.mxu0 %v2914_v55  ;;  %v2102_v49 = vld [vmem:[#allocation2] sm:$0x7f]  ;;  %v1223_v31 = vld [vmem:[%s2569_s29 + $0x18] sm:$0xff] }
 0x1f9   : > { %v1736_v63 = vld [vmem:[#allocation2 + $0x11] sm:$0x7f] }
 0x1fa   : > { %1729 = vst.msk [vmem:[#allocation2 + $0x18] sm:$0x7f] %vm365_vm2, %v1725_v59  ;;  %2445 = vmatmul.msk.f32.vlgmr.msra.gmra.mxu2 %vm239_vm1, %v1736_v63  ;;  %v1864_v26 = vld [vmem:[#allocation2 + $0x10] sm:$0xff] }
 0x1fb   : > { %2046 = vmatpush.msra.mxu2 %v2902_v35  ;;  %v835_v35 = vld [vmem:[#allocation3 + $0x8] sm:$0x7f] }
 0x1ff   : > { %2452 = vmatmul.msk.f32.vlgmr.msrb.gmra.mxu1 %vm239_vm1, %v1863_v27  ;;  %2459 = vmatmul.msk.f32.vlgmr.msra.gmra.mxu0 %vm239_vm1, %v1862_v54 }
 0x200   : > { %2151 = vmatpush.msrb.mxu1 %v2936_v7 }
 0x201   : > { %v1737_v11 = vld [vmem:[#allocation2 + $0x19] sm:$0x7f] }
 0x202   : > { %2446 = vmatmul.msk.f32.vlgmr.msra.gmra.mxu3 %vm239_vm1, %v1737_v11  ;;  %2453 = vmatmul.msk.f32.vlgmr.msrb.gmra.mxu2 %vm239_vm1, %v1864_v26  ;;  %v1865_v7 = vld [vmem:[#allocation2 + $0x18] sm:$0xff] }
 0x203   : > { %2069 = vmatpush.msra.mxu3 %v2924_v60  ;;  %2174 = vmatpush.msrb.mxu2 %v2929_v61  ;;  %v2103_v60 = vld [vmem:[#allocation2 + $0x8] sm:$0x7f]  ;;  %v2104_v61 = vld [vmem:[#allocation2 + $0x10] sm:$0x7f]  ;;  %v2105_v4 = vld [vmem:[#allocation2 + $0x18] sm:$0x7f] }
 0x207   : > { %2460 = vmatmul.msk.f32.vlgmr.msra.gmra.mxu1 %vm239_vm1, %v1863_v27  ;;  %2467 = vmatmul.msk.f32.vlgmr.msrb.gmra.mxu0 %vm239_vm1, %v2102_v49 }
 0x209   : > { %v845_v55 = vpop.permute.xlu2 %844 }
 0x20a   : > { %v855_v32 = vadd.f32 %v845_v55, %v835_v35  ;;  %2454 = vmatmul.msk.f32.vlgmr.msrb.gmra.mxu3 %vm239_vm1, %v1865_v7  ;;  %2461 = vmatmul.msk.f32.vlgmr.msra.gmra.mxu2 %vm239_vm1, %v1864_v26 }
 0x20b   : > { %2197 = vmatpush.msrb.mxu3 %v2948_v8 }
 0x20c   : > { %860 = vst.msk [vmem:[#allocation3 + $0x8] sm:$0x7f] %vm858_vm4, %v855_v32 }
 0x20f   : > { %2468 = vmatmul.msk.f32.vlgmr.msrb.gmra.mxu1 %vm239_vm1, %v2103_v60 }
 0x211   : > { %v1086_v2 = vpop.permute.xlu2 %1085 }
 0x212   : > { %2462 = vmatmul.msk.f32.vlgmr.msra.gmra.mxu3 %vm239_vm1, %v1865_v7  ;;  %2469 = vmatmul.msk.f32.vlgmr.msrb.gmra.mxu2 %vm239_vm1, %v2104_v61 }
 0x213   : > { %v965_v33 = vld [vmem:[#allocation3 + $0x8] sm:$0xff] }
 0x214   : > { %v969_v34 = vadd.f32 %v965_v33, %v3034_v43  ;;  %v837_v43 = vld [vmem:[#allocation3 + $0x18] sm:$0x7f] }
 0x216   : > { %973 = vst.msk [vmem:[#allocation3 + $0x8] sm:$0xff] %vm263_vm0, %v969_v34 }
 0x219   : > { %v843_v56 = vpop.permute.xlu1 %842 }
 0x21a   : > { %v854_v62 = vadd.f32 %v843_v56, %v834_v45  ;;  %2470 = vmatmul.msk.f32.vlgmr.msrb.gmra.mxu3 %vm239_vm1, %v2105_v4 }
 0x21c   : > { %859 = vst.msk [vmem:[#allocation3] sm:$0x7f] %vm858_vm4, %v854_v62 }
 0x21d   : > { %v1078_v15 = vld [vmem:[#allocation3 + $0x8] sm:$0xff] }
 0x223   : > { %v964_v8 = vld [vmem:[#allocation3] sm:$0xff] }
 0x224   : > { %v968_v9 = vadd.f32 %v964_v8, %v3028_v39  ;;  %v847_v10 = vpop.permute.xlu0 %846 }
 0x225   : > { %v856_v0 = vadd.f32 %v847_v10, %v836_v6 }
 0x226   : > { %972 = vst.msk [vmem:[#allocation3] sm:$0xff] %vm263_vm0, %v968_v9 }
 0x227   : > { %861 = vst.msk [vmem:[#allocation3 + $0x10] sm:$0x7f] %vm858_vm4, %v856_v0 }
 0x22c   : > { %v849_v1 = vpop.permute.xlu1 %848 }
 0x22d   : > { %v1077_v30 = vld [vmem:[#allocation3] sm:$0xff]  ;;  %v857_v12 = vadd.f32 %v849_v1, %v837_v43 }
 0x22e   : > { %v1097_v3 = vadd.f32 %v1086_v2, %v1077_v30  ;;  %v966_v13 = vld [vmem:[#allocation3 + $0x10] sm:$0xff] }
 0x22f   : > { %v970_v14 = vadd.f32 %v966_v13, %v3037_v48  ;;  %862 = vst.msk [vmem:[#allocation3 + $0x18] sm:$0x7f] %vm858_vm4, %v857_v12 }
 0x230   : > { %1102 = vst.msk [vmem:[#allocation3] sm:$0xff] %vm1101_vm5, %v1097_v3 }
 0x231   : > { %v1088_v39 = vpop.permute.xlu0 %1087  ;;  %974 = vst.msk [vmem:[#allocation3 + $0x10] sm:$0xff] %vm263_vm0, %v970_v14 }
 0x232   : > { %v1098_v16 = vadd.f32 %v1088_v39, %v1078_v15 }
 0x234   : > { %1103 = vst.msk [vmem:[#allocation3 + $0x8] sm:$0xff] %vm1101_vm5, %v1098_v16  ;;  %v1090_v48 = vpop.permute.xlu1 %1089 }
 0x236   : > { %v967_v20 = vld [vmem:[#allocation3 + $0x18] sm:$0xff] }
 0x237   : > { %v1207_v17 = vld [vmem:[#allocation3 + $0x1] sm:$0x7f]  ;;  %v971_v21 = vadd.f32 %v967_v20, %v3043_v52  ;;  %v1092_v52 = vpop.permute.xlu2 %1091 }
 0x238   : > { %v1211_v18 = vadd.f32 %v1207_v17, %v3040_v51  ;;  %v1079_v22 = vld [vmem:[#allocation3 + $0x10] sm:$0xff] }
 0x239   : > { %v1099_v23 = vadd.f32 %v1090_v48, %v1079_v22  ;;  %975 = vst.msk [vmem:[#allocation3 + $0x18] sm:$0xff] %vm263_vm0, %v971_v21 }
 0x23a   : > { %1216 = vst.msk [vmem:[#allocation3 + $0x1] sm:$0x7f] %vm1215_vm6, %v1211_v18 }
 0x23b   : > { %v1208_v24 = vld [vmem:[#allocation3 + $0x9] sm:$0x7f]  ;;  %1104 = vst.msk [vmem:[#allocation3 + $0x10] sm:$0xff] %vm1101_vm5, %v1099_v23 }
 0x23c   : > { %v1212_v25 = vadd.f32 %v1208_v24, %v3046_v5 }
 0x23e   : > { %1217 = vst.msk [vmem:[#allocation3 + $0x9] sm:$0x7f] %vm1215_vm6, %v1212_v25 }
 0x240   : > { %v1080_v29 = vld [vmem:[#allocation3 + $0x18] sm:$0xff] }
 0x241   : > { %v1224_v51 = vld [vmem:[#allocation3] sm:$0xff]  ;;  %v1100_v5 = vadd.f32 %v1092_v52, %v1080_v29 }
 0x242   : > { %v1228_v37 = vsub.f32 %v1220_v28, %v1224_v51  ;;  %1730 = vst.msk [vmem:[#allocation3] sm:$0xff] %vm729_vm3, %v2505_v19  ;;  %v1209_v40 = vld [vmem:[#allocation3 + $0x11] sm:$0x7f]  ;;  %v2471_v52 = vld [vmem:[%s2569_s29 + $0x20] sm:$0xff] }
 0x243   : > { %v1213_v41 = vadd.f32 %v1209_v40, %v3049_v58  ;;  %1105 = vst.msk [vmem:[#allocation3 + $0x18] sm:$0xff] %vm1101_vm5, %v1100_v5 }
 0x244   : > { %1232 = vst.msk [vmem:[%s3125_s10] sm:$0xff] %vm729_vm3, %v1228_v37 }
 0x245   : > { %v1225_v42 = vld [vmem:[#allocation3 + $0x8] sm:$0xff]  ;;  %1218 = vst.msk [vmem:[#allocation3 + $0x11] sm:$0x7f] %vm1215_vm6, %v1213_v41 }
 0x246   : > { %v1229_v44 = vsub.f32 %v1221_v38, %v1225_v42  ;;  %1731 = vst.msk [vmem:[#allocation3 + $0x8] sm:$0xff] %vm729_vm3, %v2505_v19  ;;  %v2472_v41 = vld [vmem:[%s2569_s29 + $0x28] sm:$0xff] }
 0x248   : > { %1233 = vst.msk [vmem:[%s3125_s10 + $0x8] sm:$0xff] %vm729_vm3, %v1229_v44 }
 0x249   : > { %v1834_v34 = vld [vmem:[#allocation3] sm:$0x7f] }
 0x24a   : > { %v1210_v46 = vld [vmem:[#allocation3 + $0x19] sm:$0x7f] }
 0x24b   : > { %v1214_v53 = vadd.f32 %v1210_v46, %v3053_v36 }
 0x24c   : > { %v1226_v58 = vld [vmem:[#allocation3 + $0x10] sm:$0xff] }
 0x24d   : > { %1219 = vst.msk [vmem:[#allocation3 + $0x19] sm:$0x7f] %vm1215_vm6, %v1214_v53  ;;  %v1230_v54 = vsub.f32 %v1222_v50, %v1226_v58  ;;  %v1835_v8 = vld [vmem:[#allocation3 + $0x8] sm:$0x7f]  ;;  %v2473_v58 = vld [vmem:[%s2569_s29 + $0x30] sm:$0xff] }
 0x24e   : > { %1732 = vst.msk [vmem:[#allocation3 + $0x10] sm:$0xff] %vm729_vm3, %v2505_v19 }
 0x24f   : > { %1234 = vst.msk [vmem:[%s3125_s10 + $0x10] sm:$0xff] %vm729_vm3, %v1230_v54 }
 0x254   : > { %v1227_v47 = vld [vmem:[#allocation3 + $0x18] sm:$0xff] }
 0x255   : > { %v1231_v57 = vsub.f32 %v1223_v31, %v1227_v47  ;;  %1733 = vst.msk [vmem:[#allocation3 + $0x18] sm:$0xff] %vm729_vm3, %v2505_v19  ;;  %v1836_v60 = vld [vmem:[#allocation3 + $0x10] sm:$0x7f] }
 0x257   : > { %1235 = vst.msk [vmem:[%s3125_s10 + $0x18] sm:$0xff] %vm729_vm3, %v1231_v57 }
 0x25c   : > { %v1837_v12 = vld [vmem:[#allocation3 + $0x18] sm:$0x7f] }
 0x26c   : > { %v1762_v59 = vpop.f32.mrf.mxu0 }
 0x26d   : > { %1842 = vrot.lane.b32.xlu0 %v1762_v59, %s2504_s8 }
 0x274   : > { %v1785_v36 = vpop.f32.mrf.mxu1  ;;  %v1890_v63 = vpop.f32.mrf.mxu0 }
 0x275   : > { %1844 = vrot.lane.b32.xlu1 %v1785_v36, %s2504_s8  ;;  %v2474_v36 = vld [vmem:[%s2569_s29 + $0x38] sm:$0xff] }
 0x27c   : > { %v1913_v27 = vpop.f32.mrf.mxu1  ;;  %v2002_v11 = vpop.f32.mrf.mxu0 }
 0x27d   : > { %2082 = vrot.lane.b32.xlu1 %v2002_v11, %s2504_s8  ;;  %v1808_v26 = vpop.f32.mrf.mxu2 }
 0x27e   : > { %1846 = vrot.lane.b32.xlu2 %v1808_v26, %s2504_s8 }
 0x284   : > { %v2025_v49 = vpop.f32.mrf.mxu1  ;;  %v2130_v17 = vpop.f32.mrf.mxu0 }
 0x285   : > { %v1831_v35 = vpop.f32.mrf.mxu3  ;;  %v1936_v55 = vpop.f32.mrf.mxu2 }
 0x286   : > { %2084 = vrot.lane.b32.xlu2 %v2025_v49, %s2504_s8  ;;  %1848 = vrot.lane.b32.xlu0 %v1831_v35, %s2504_s8 }
 0x28c   : > { %v2153_v25 = vpop.f32.mrf.mxu1 }
 0x28d   : > { %v1959_v19 = vpop.f32.mrf.mxu3  ;;  %v2048_v32 = vpop.f32.mrf.mxu2 }
 0x28e   : > { %2086 = vrot.lane.b32.xlu0 %v2048_v32, %s2504_s8 }
 0x295   : > { %v2071_v7 = vpop.f32.mrf.mxu3  ;;  %v2176_v5 = vpop.f32.mrf.mxu2 }
 0x296   : > { %2088 = vrot.lane.b32.xlu1 %v2071_v7, %s2504_s8 }
 0x29d   : > { %v2199_v47 = vpop.f32.mrf.mxu3 }
 0x2d8   : > { %v1847_v61 = vpop.permute.xlu2 %1846 }
 0x2d9   : > { %v1856_v33 = vadd.f32 %v1847_v61, %v1836_v60 }
 0x2db   : > { %1860 = vst.msk [vmem:[#allocation3 + $0x10] sm:$0x7f] %vm858_vm4, %v1856_v33 }
 0x2df   : > { %v1843_v45 = vpop.permute.xlu0 %1842 }
 0x2e0   : > { %v1854_v56 = vadd.f32 %v1843_v45, %v1834_v34  ;;  %v2085_v39 = vpop.permute.xlu2 %2084 }
 0x2e2   : > { %1858 = vst.msk [vmem:[#allocation3] sm:$0x7f] %vm858_vm4, %v1854_v56  ;;  %v1964_v62 = vld [vmem:[#allocation3 + $0x10] sm:$0xff] }
 0x2e3   : > { %v1968_v4 = vadd.f32 %v1964_v62, %v1936_v55 }
 0x2e5   : > { %1972 = vst.msk [vmem:[#allocation3 + $0x10] sm:$0xff] %vm263_vm0, %v1968_v4 }
 0x2e7   : > { %v1845_v6 = vpop.permute.xlu1 %1844 }
 0x2e8   : > { %v1855_v9 = vadd.f32 %v1845_v6, %v1835_v8 }
 0x2e9   : > { %v1962_v10 = vld [vmem:[#allocation3] sm:$0xff] }
 0x2ea   : > { %1859 = vst.msk [vmem:[#allocation3 + $0x8] sm:$0x7f] %vm858_vm4, %v1855_v9  ;;  %v1966_v0 = vadd.f32 %v1962_v10, %v1890_v63 }
 0x2ec   : > { %1970 = vst.msk [vmem:[#allocation3] sm:$0xff] %vm263_vm0, %v1966_v0  ;;  %v2076_v22 = vld [vmem:[#allocation3 + $0x10] sm:$0xff] }
 0x2ef   : > { %v2083_v1 = vpop.permute.xlu1 %2082 }
 0x2f1   : > { %v1963_v43 = vld [vmem:[#allocation3 + $0x8] sm:$0xff] }
 0x2f2   : > { %v1967_v2 = vadd.f32 %v1963_v43, %v1913_v27 }
 0x2f3   : > { %v2074_v30 = vld [vmem:[#allocation3] sm:$0xff] }
 0x2f4   : > { %1971 = vst.msk [vmem:[#allocation3 + $0x8] sm:$0xff] %vm263_vm0, %v1967_v2  ;;  %v2094_v3 = vadd.f32 %v2083_v1, %v2074_v30 }
 0x2f6   : > { %2098 = vst.msk [vmem:[#allocation3] sm:$0xff] %vm1101_vm5, %v2094_v3 }
 0x2f8   : > { %v1849_v13 = vpop.permute.xlu0 %1848 }
 0x2f9   : > { %v1857_v14 = vadd.f32 %v1849_v13, %v1837_v12 }
 0x2fb   : > { %v2075_v15 = vld [vmem:[#allocation3 + $0x8] sm:$0xff]  ;;  %1861 = vst.msk [vmem:[#allocation3 + $0x18] sm:$0x7f] %vm858_vm4, %v1857_v14 }
 0x2fc   : > { %v2095_v16 = vadd.f32 %v2085_v39, %v2075_v15 }
 0x2fd   : > { %v2202_v18 = vld [vmem:[#allocation3 + $0x1] sm:$0x7f] }
 0x2fe   : > { %2099 = vst.msk [vmem:[#allocation3 + $0x8] sm:$0xff] %vm1101_vm5, %v2095_v16  ;;  %v2206_v20 = vadd.f32 %v2202_v18, %v2130_v17 }
 0x300   : > { %2210 = vst.msk [vmem:[#allocation3 + $0x1] sm:$0x7f] %vm1215_vm6, %v2206_v20  ;;  %v2087_v21 = vpop.permute.xlu0 %2086 }
 0x301   : > { %v2096_v48 = vadd.f32 %v2087_v21, %v2076_v22 }
 0x302   : > { %v1965_v23 = vld [vmem:[#allocation3 + $0x18] sm:$0xff] }
 0x303   : > { %2100 = vst.msk [vmem:[#allocation3 + $0x10] sm:$0xff] %vm1101_vm5, %v2096_v48  ;;  %v1969_v24 = vadd.f32 %v1965_v23, %v1959_v19 }
 0x305   : > { %v2203_v28 = vld [vmem:[#allocation3 + $0x9] sm:$0x7f]  ;;  %1973 = vst.msk [vmem:[#allocation3 + $0x18] sm:$0xff] %vm263_vm0, %v1969_v24 }
 0x306   : > { %v2207_v51 = vadd.f32 %v2203_v28, %v2153_v25 }
 0x307   : > { %v2218_v29 = vld [vmem:[#allocation3] sm:$0xff] }
 0x308   : > { %2211 = vst.msk [vmem:[#allocation3 + $0x9] sm:$0x7f] %vm1215_vm6, %v2207_v51  ;;  %v2222_v37 = vsub.f32 %v2471_v52, %v2218_v29  ;;  %v2089_v44 = vpop.permute.xlu1 %2088 }
 0x30a   : > { %2475 = vst.msk [vmem:[%s3125_s10 + $0x20] sm:$0xff] %vm729_vm3, %v2222_v37  ;;  %v2204_v38 = vld [vmem:[#allocation3 + $0x11] sm:$0x7f] }
 0x30b   : > { %v2208_v40 = vadd.f32 %v2204_v38, %v2176_v5 }
 0x30c   : > { %v2077_v42 = vld [vmem:[#allocation3 + $0x18] sm:$0xff] }
 0x30d   : > { %2212 = vst.msk [vmem:[#allocation3 + $0x11] sm:$0x7f] %vm1215_vm6, %v2208_v40  ;;  %v2097_v46 = vadd.f32 %v2089_v44, %v2077_v42 }
 0x30f   : > { %v2219_v50 = vld [vmem:[#allocation3 + $0x8] sm:$0xff]  ;;  %2101 = vst.msk [vmem:[#allocation3 + $0x18] sm:$0xff] %vm1101_vm5, %v2097_v46 }
 0x310   : > { %v2223_v53 = vsub.f32 %v2472_v41, %v2219_v50 }
 0x312   : > { %2476 = vst.msk [vmem:[%s3125_s10 + $0x28] sm:$0xff] %vm729_vm3, %v2223_v53 }
 0x314   : > { %v2220_v54 = vld [vmem:[#allocation3 + $0x10] sm:$0xff] }
 0x315   : > { %v2224_v31 = vsub.f32 %v2473_v58, %v2220_v54 }
 0x316   : > { %v2205_v57 = vld [vmem:[#allocation3 + $0x19] sm:$0x7f] }
 0x317   : > { %2477 = vst.msk [vmem:[%s3125_s10 + $0x30] sm:$0xff] %vm729_vm3, %v2224_v31  ;;  %v2209_v59 = vadd.f32 %v2205_v57, %v2199_v47 }
 0x319   : > { %2213 = vst.msk [vmem:[#allocation3 + $0x19] sm:$0x7f] %vm1215_vm6, %v2209_v59 }
 0x320   : > { %v2221_v63 = vld [vmem:[#allocation3 + $0x18] sm:$0xff] }
 0x321   : > { %v2225_v27 = vsub.f32 %v2474_v36, %v2221_v63 }
 0x323   : > { %2478 = vst.msk [vmem:[%s3125_s10 + $0x38] sm:$0xff] %vm729_vm3, %v2225_v27 }
 0x324 PF: > { %s14_s15 = sadd.s32 1, %s2501_s15  }
 0x325   : > { %p11_p4 = scmp.ge.s32.totalorder %s14_s15, 4  }
 0x327   :  { %13 = sbr.rel (!%p11_p4) target bundleno = 1 (0x1), region = 78 }

</bundles_post_ra>
